<compile_context>
chip_gen: v7x
topology: tpu7x:2x2x1
jax: 0.10.0
libtpu: 0.0.40
codegen_flags: <defaults>
</compile_context>

<pallas_src>
import functools
import math

import jax
import jax.numpy as jnp
import numpy as np
from jax.experimental import pallas as pl
from jax.experimental.pallas import tpu as pltpu

EPS = 1e-5  # torch.nn.LayerNorm default


def _layernorm(x, w, b):
    mu = jnp.mean(x, axis=-1, keepdims=True)
    var = jnp.mean((x - mu) ** 2, axis=-1, keepdims=True)
    return (x - mu) * jax.lax.rsqrt(var + EPS) * w + b


def _tpu_tuning():
    """Chip-aware knobs: scoped-VMEM limit, batch-tile targets."""
    vmem_cap = None
    try:
        info = pltpu.get_tpu_info()
        vmem_cap = getattr(info, "vmem_capacity_bytes", None)
    except Exception:
        pass
    if vmem_cap is None:
        # unknown chip: conservative limit that is safe even on 64-MiB (v7x) parts
        return dict(target_rows=256, min_steps=2, vmem_limit=48 * 1024 * 1024)
    if vmem_cap <= 64 * 1024 * 1024:
        # v7x-class: 64 MiB VMEM / 2 TensorCores -> <=48 MiB scoped, >=2 steps per core
        return dict(target_rows=256, min_steps=4, vmem_limit=48 * 1024 * 1024)
    # v5e / v6e: 128 MiB physical VMEM.
    # TODO(synk): distinguish v5e (128x128-native MXU -> target_rows=128) from v6e.
    return dict(target_rows=256, min_steps=2, vmem_limit=96 * 1024 * 1024)


def _pick_batch_tile(B, S, *, target_rows=256, min_steps=2):
    """Largest divisor of B with bt*S <= target_rows, keeping >= min_steps grid steps
    when possible (so every TensorCore gets pipelined work)."""
    per_step = max(1, target_rows // S)
    cands = [bt for bt in range(1, B + 1) if B % bt == 0 and bt <= per_step]
    pref = [bt for bt in cands if B // bt >= min_steps]
    return max(pref) if pref else max(cands)


# --------------------------------------------------------------------------
# Pallas kernel: one pre-LN transformer residual block, Bt batch rows per grid step
# --------------------------------------------------------------------------
def _resblock_kernel(x_ref, mask_ref, ln1w_ref, ln1b_ref, wqkv_ref, bqkv_ref,
                     wo_ref, bo_ref, ln2w_ref, ln2b_ref, w1_ref, b1_ref,
                     w2_ref, b2_ref, o_ref, *, num_heads):
    Bt, S, D = x_ref.shape
    H = num_heads
    hd = D // H
    M = Bt * S

    # residual stream in f32, flattened to (M, D) so projections/MLP are full-M matmuls
    x = x_ref[...].astype(jnp.float32).reshape(M, D)

    # ---- multi-head self-attention (pre-LN). 1/sqrt(hd) is pre-folded (host side)
    #      into the Q columns of wqkv/bqkv, so there is no in-kernel scale multiply.
    h = _layernorm(x, ln1w_ref[...].astype(jnp.float32), ln1b_ref[...].astype(jnp.float32))
    wqkv = wqkv_ref[...]                                               # bf16 (D, 3D)
    qkv = jnp.dot(h.astype(wqkv.dtype), wqkv,
                  preferred_element_type=jnp.float32) + bqkv_ref[...]  # (M, 3D) f32

    # Head split: lane-aligned D-slice + reshape + ONE lane-layout-aware transpose
    # (pltpu.einshape) per tensor.  Batch index n enumerates (head, batch-row).
    def _heads(z):                                   # (M, D) -> (H*Bt, S, hd)
        z = z.reshape(M, H, hd)
        z = pltpu.einshape("mhd->hmd", z)            # (H, M, hd)
        return z.reshape(H * Bt, S, hd)

    q = _heads(qkv[:, 0 * D:1 * D])
    k = _heads(qkv[:, 1 * D:2 * D])
    v = _heads(qkv[:, 2 * D:3 * D])

    # batched scores / softmax / PV over n = H*Bt (single pair of batched dot_generals)
    s = jnp.einsum('nqd,nkd->nqk', q, k, preferred_element_type=jnp.float32)
    s = s + mask_ref[...]                            # (S, S) broadcast over n
    s = s - jnp.max(s, axis=-1, keepdims=True)
    p = jnp.exp(s)
    p = p * pl.reciprocal(jnp.sum(p, axis=-1, keepdims=True), approx=True)
    ctx = jnp.einsum('nqk,nkd->nqd', p, v, preferred_element_type=jnp.float32)  # (H*Bt,S,hd)

    # heads back onto the lane axis (inverse einshape) -> ONE (M, D) out-projection
    attn = pltpu.einshape("hmd->mhd", ctx.reshape(H, M, hd)).reshape(M, D)
    wo = wo_ref[...]
    x = x + jnp.dot(attn.astype(wo.dtype), wo,
                    preferred_element_type=jnp.float32) + bo_ref[...]

    # ---- MLP (pre-LN) ----
    h2 = _layernorm(x, ln2w_ref[...].astype(jnp.float32), ln2b_ref[...].astype(jnp.float32))
    w1 = w1_ref[...]
    m = jnp.dot(h2.astype(w1.dtype), w1, preferred_element_type=jnp.float32) + b1_ref[...]
    m = jax.nn.gelu(m, approximate=True)   # TODO(synk): OpenCLIP nn.GELU is erf-exact
    w2 = w2_ref[...]
    x = x + jnp.dot(m.astype(w2.dtype), w2, preferred_element_type=jnp.float32) + b2_ref[...]

    o_ref[...] = x.reshape(Bt, S, D).astype(o_ref.dtype)   # bf16 residual handoff


def _apply_resblock(x, blk, mask, num_heads, bt, vmem_limit):
    B, S, D = x.shape
    wnames = ['ln1w', 'ln1b', 'wqkv', 'bqkv', 'wo', 'bo',
              'ln2w', 'ln2b', 'w1', 'b1', 'w2', 'b2']
    wargs = [blk[n] for n in wnames]
    # Constant operands (mask + all weights): whole-array VMEM residency, copied once.
    # TODO(synk): at real CLIP widths on v7x (64 MiB VMEM) pipeline wqkv/w1/w2 over an
    # output-column grid axis (pl.Buffered) or prefetch layer i+1 weights cross-call
    # instead of holding every weight whole-array VMEM-resident.
    in_specs = [pl.BlockSpec((bt, S, D), lambda i: (i, 0, 0))]
    in_specs += [pl.BlockSpec(memory_space=pltpu.MemorySpace.VMEM)
                 for _ in range(1 + len(wargs))]
    return pl.pallas_call(
        functools.partial(_resblock_kernel, num_heads=num_heads),
        out_shape=jax.ShapeDtypeStruct((B, S, D), x.dtype),   # bf16 residual stream
        grid=(B // bt,),
        in_specs=in_specs,
        out_specs=pl.BlockSpec((bt, S, D), lambda i: (i, 0, 0)),
        compiler_params=pltpu.CompilerParams(
            dimension_semantics=("parallel",),
            vmem_limit_bytes=vmem_limit),
    )(x, mask, *wargs)


# --------------------------------------------------------------------------
# Pallas kernel: final LayerNorm + EOT-token gather + text projection
# (whole batch per step; single LN; dense (B, Dp) projection output)
# --------------------------------------------------------------------------
def _final_kernel(eot_ref, x_ref, lnw_ref, lnb_ref, proj_ref, xo_ref, xt_ref):
    Bt, S, D = x_ref.shape
    x = x_ref[...].astype(jnp.float32).reshape(Bt * S, D)
    xn = _layernorm(x, lnw_ref[...].astype(jnp.float32), lnb_ref[...].astype(jnp.float32))
    xo_ref[...] = xn.reshape(Bt, S, D).astype(xo_ref.dtype)

    # EOT rows gathered (dynamic sublane slice) from the already-normalized output block,
    # stacked into a sublane/lane-dense (Bt, D) tile, projected with ONE matmul.
    base = pl.program_id(0) * Bt
    rows = jnp.concatenate(
        [xo_ref[j, pl.ds(eot_ref[base + j], 1), :] for j in range(Bt)], axis=0)  # (Bt, D)
    proj = proj_ref[...]
    xt_ref[...] = jnp.dot(rows.astype(proj.dtype), proj,
                          preferred_element_type=jnp.float32).astype(xt_ref.dtype)


def _apply_final(x, eot_idx, lnw, lnb, proj, vmem_limit):
    B, S, D = x.shape
    Dp = proj.shape[1]
    grid_spec = pltpu.PrefetchScalarGridSpec(
        num_scalar_prefetch=1,
        grid=(1,),                      # whole batch in one step: every block == full array
        in_specs=[
            pl.BlockSpec((B, S, D), lambda i, eot: (0, 0, 0)),
            pl.BlockSpec(memory_space=pltpu.MemorySpace.VMEM),
            pl.BlockSpec(memory_space=pltpu.MemorySpace.VMEM),
            pl.BlockSpec(memory_space=pltpu.MemorySpace.VMEM),
        ],
        out_specs=[
            pl.BlockSpec((B, S, D), lambda i, eot: (0, 0, 0)),
            pl.BlockSpec((B, Dp), lambda i, eot: (0, 0)),
        ],
    )
    x_out, xt = pl.pallas_call(
        _final_kernel,
        out_shape=(jax.ShapeDtypeStruct((B, S, D), jnp.float32),
                   jax.ShapeDtypeStruct((B, Dp), jnp.float32)),
        grid_spec=grid_spec,
        compiler_params=pltpu.CompilerParams(
            dimension_semantics=("arbitrary",),
            vmem_limit_bytes=vmem_limit),
    )(eot_idx, x, lnw, lnb, proj)
    return x_out, xt


# --------------------------------------------------------------------------
# Parameters (deterministic synthetic init — shapes follow the CLIP text tower).
# Matmul weights in bf16 (f32 accumulation in-kernel); LN params / biases in f32.
# --------------------------------------------------------------------------
def _init_params(key, vocab, width, layers, max_length, proj_dim):
    std = 0.02
    mlp = 4 * width
    bf16 = jnp.bfloat16
    keys = jax.random.split(key, 5 + layers)
    params = {
        'token_embedding': std * jax.random.normal(keys[0], (vocab, width), jnp.float32),
        'positional_embedding': std * jax.random.normal(keys[1], (max_length, width), jnp.float32),
        'ln_final_w': 1.0 + 0.02 * jax.random.normal(keys[2], (1, width), jnp.float32),
        'ln_final_b': 0.02 * jax.random.normal(keys[3], (1, width), jnp.float32),
        'text_projection': (std * jax.random.normal(keys[4], (width, proj_dim), jnp.float32)).astype(bf16),
        'blocks': [],
    }
    for i in range(layers):
        ks = jax.random.split(keys[5 + i], 12)
        params['blocks'].append({
            'ln1w': 1.0 + 0.02 * jax.random.normal(ks[0], (1, width), jnp.float32),
            'ln1b': 0.02 * jax.random.normal(ks[1], (1, width), jnp.float32),
            'wqkv': (std * jax.random.normal(ks[2], (width, 3 * width), jnp.float32)).astype(bf16),
            'bqkv': 0.02 * jax.random.normal(ks[3], (1, 3 * width), jnp.float32),
            'wo': (std * jax.random.normal(ks[4], (width, width), jnp.float32)).astype(bf16),
            'bo': 0.02 * jax.random.normal(ks[5], (1, width), jnp.float32),
            'ln2w': 1.0 + 0.02 * jax.random.normal(ks[6], (1, width), jnp.float32),
            'ln2b': 0.02 * jax.random.normal(ks[7], (1, width), jnp.float32),
            'w1': (std * jax.random.normal(ks[8], (width, mlp), jnp.float32)).astype(bf16),
            'b1': 0.02 * jax.random.normal(ks[9], (1, mlp), jnp.float32),
            'w2': (std * jax.random.normal(ks[10], (mlp, width), jnp.float32)).astype(bf16),
            'b2': 0.02 * jax.random.normal(ks[11], (1, width), jnp.float32),
        })
    return params


def _fold_q_scale(blocks, heads):
    """Fold 1/sqrt(head_dim) into the Q columns of the QKV projection (host-side, once)."""
    folded = []
    for blk in blocks:
        D = blk['wo'].shape[0]
        scale = 1.0 / math.sqrt(D // heads)
        b = dict(blk)
        b['wqkv'] = blk['wqkv'].at[:, :D].multiply(scale)
        b['bqkv'] = blk['bqkv'].at[:, :D].multiply(scale)
        folded.append(b)
    return folded


class FrozenOpenCLIPTextVisualEmbedder:
    """JAX/Pallas re-implementation of the PyTorch module's forward pass (text branch)."""
    LAYERS = ['last', 'penultimate']

    def __init__(self, vocab_size=64, width=32, heads=4, layers=2,
                 max_length=8, proj_dim=32, layer='last', key=None):
        assert layer in self.LAYERS
        self.layer_idx = 0 if layer == 'last' else 1
        self.heads = heads
        self.max_length = max_length
        key = jax.random.PRNGKey(0) if key is None else key
        self.params = _init_params(key, vocab_size, width, layers, max_length, proj_dim)
        self.kernel_blocks = _fold_q_scale(self.params['blocks'], heads)
        self._tune = _tpu_tuning()
        # causal mask identical to open_clip build_attention_mask(), but with a finite
        # large-negative constant instead of -inf (NaN-safe under exp / max).
        self.attn_mask = jnp.triu(
            jnp.full((max_length, max_length), -1e9, dtype=jnp.float32), k=1)

    def __call__(self, image=None, tokens=None):
        # TODO(synk): visual tower (ViT encode_image) and BPE tokenizer have no clean
        # in-script equivalent; token ids are taken directly and xi=None mirrors
        # forward(image=None, text=...).
        xi = None
        xt, x = self.encode_with_transformer(tokens)
        return xi, xt, x

    def encode_with_transformer(self, tokens):
        p = self.params
        x = jnp.take(p['token_embedding'], tokens, axis=0) + p['positional_embedding']
        x = x.astype(jnp.bfloat16)                      # bf16 inter-layer residual stream
        B, S, _ = x.shape
        bt = _pick_batch_tile(B, S, target_rows=self._tune['target_rows'],
                              min_steps=self._tune['min_steps'])
        n_run = len(self.kernel_blocks) - self.layer_idx
        for blk in self.kernel_blocks[:n_run]:
            x = _apply_resblock(x, blk, self.attn_mask, self.heads, bt,
                                self._tune['vmem_limit'])
        eot = jnp.argmax(tokens, axis=-1).astype(jnp.int32)   # EOT = highest token id
        x, xt = _apply_final(x, eot, p['ln_final_w'], p['ln_final_b'],
                             p['text_projection'], self._tune['vmem_limit'])
        return xt, x


# --------------------------------------------------------------------------
# Pure-JAX reference (same math/dtypes, no Pallas) for correctness checking
# --------------------------------------------------------------------------
def _reference(tokens, embedder):
    p, mask, H = embedder.params, embedder.attn_mask, embedder.heads
    x = jnp.take(p['token_embedding'], tokens, axis=0) + p['positional_embedding']
    x = x.astype(jnp.bfloat16).astype(jnp.float32)      # mirror bf16 residual handoff
    B, S, D = x.shape
    hd = D // H
    n_run = len(p['blocks']) - embedder.layer_idx
    for blk in p['blocks'][:n_run]:
        h = _layernorm(x, blk['ln1w'], blk['ln1b'])
        qkv = jnp.dot(h.astype(blk['wqkv'].dtype), blk['wqkv'],
                      preferred_element_type=jnp.float32) + blk['bqkv']
        q = (qkv[..., :D] * (1.0 / math.sqrt(hd))).reshape(B, S, H, hd)
        k = qkv[..., D:2 * D].reshape(B, S, H, hd)
        v = qkv[..., 2 * D:].reshape(B, S, H, hd)
        s = jnp.einsum('bqhd,bkhd->bhqk', q, k) + mask
        pr = jax.nn.softmax(s, axis=-1)
        attn = jnp.einsum('bhqk,bkhd->bqhd', pr, v).reshape(B, S, D)
        x = x + jnp.dot(attn.astype(blk['wo'].dtype), blk['wo'],
                        preferred_element_type=jnp.float32) + blk['bo']
        h2 = _layernorm(x, blk['ln2w'], blk['ln2b'])
        m = jnp.dot(h2.astype(blk['w1'].dtype), blk['w1'],
                    preferred_element_type=jnp.float32) + blk['b1']
        m = jax.nn.gelu(m, approximate=True)
        x = x + jnp.dot(m.astype(blk['w2'].dtype), blk['w2'],
                        preferred_element_type=jnp.float32) + blk['b2']
        x = x.astype(jnp.bfloat16).astype(jnp.float32)  # mirror bf16 residual handoff
    xn = _layernorm(x, p['ln_final_w'], p['ln_final_b'])
    eot = jnp.argmax(tokens, axis=-1)
    xt = jnp.dot(xn[jnp.arange(B), eot].astype(p['text_projection'].dtype),
                 p['text_projection'], preferred_element_type=jnp.float32)
    return xt, xn


if __name__ == "__main__":
    key = jax.random.PRNGKey(0)
    kp, kt = jax.random.split(key)
    B, S, vocab, width, proj_dim = 4, 8, 64, 32, 32

    embedder = FrozenOpenCLIPTextVisualEmbedder(
        vocab_size=vocab, width=width, heads=4, layers=2,
        max_length=S, proj_dim=proj_dim, layer='last', key=kp)

    tokens = jax.random.randint(kt, (B, S), 1, vocab - 4, dtype=jnp.int32)
    for b, pos in enumerate([5, 3, 7, 2]):            # EOT token (argmax) per sequence
        tokens = tokens.at[b, pos].set(vocab - 1)

    xi, xt, x = embedder(image=None, tokens=tokens)
    jax.block_until_ready((xt, x))

    assert xi is None
    assert xt.shape == (B, proj_dim) and x.shape == (B, S, width)

    xt_ref, x_ref = _reference(tokens, embedder)
    np.testing.assert_allclose(np.asarray(x), np.asarray(x_ref), atol=1e-2, rtol=1e-2)
    np.testing.assert_allclose(np.asarray(xt), np.asarray(xt_ref), atol=1e-2, rtol=1e-2)

    print("KERNEL_OK")
</pallas_src>

<mosaic_0001>
module attributes {stable_mosaic.version = 11 : i64} {
  func.func @_resblock_kernel(%arg0: i32, %arg1: memref<2x8x32xbf16, #tpu.memory_space<vmem>>, %arg2: memref<8x8xf32, #tpu.memory_space<vmem>>, %arg3: memref<1x32xf32, #tpu.memory_space<vmem>>, %arg4: memref<1x32xf32, #tpu.memory_space<vmem>>, %arg5: memref<32x96xbf16, #tpu.memory_space<vmem>>, %arg6: memref<1x96xf32, #tpu.memory_space<vmem>>, %arg7: memref<32x32xbf16, #tpu.memory_space<vmem>>, %arg8: memref<1x32xf32, #tpu.memory_space<vmem>>, %arg9: memref<1x32xf32, #tpu.memory_space<vmem>>, %arg10: memref<1x32xf32, #tpu.memory_space<vmem>>, %arg11: memref<32x128xbf16, #tpu.memory_space<vmem>>, %arg12: memref<1x128xf32, #tpu.memory_space<vmem>>, %arg13: memref<128x32xbf16, #tpu.memory_space<vmem>>, %arg14: memref<1x32xf32, #tpu.memory_space<vmem>>, %arg15: memref<2x8x32xbf16, #tpu.memory_space<vmem>>) attributes {dimension_semantics = [#tpu.dimension_semantics<parallel>], iteration_bounds = array<i64: 2>, scalar_prefetch = 0 : i64, scratch_operands = 0 : i64, tpu.core_type = #tpu.core_type<tc>, window_params = [{transform_indices = @transform_0, window_bounds = array<i64: 2, 8, 32>}, {pipeline_mode = #tpu.pipeline_mode<synchronous>, transform_indices = @transform_1, window_bounds = array<i64: 8, 8>}, {pipeline_mode = #tpu.pipeline_mode<synchronous>, transform_indices = @transform_2, window_bounds = array<i64: 1, 32>}, {pipeline_mode = #tpu.pipeline_mode<synchronous>, transform_indices = @transform_3, window_bounds = array<i64: 1, 32>}, {pipeline_mode = #tpu.pipeline_mode<synchronous>, transform_indices = @transform_4, window_bounds = array<i64: 32, 96>}, {pipeline_mode = #tpu.pipeline_mode<synchronous>, transform_indices = @transform_5, window_bounds = array<i64: 1, 96>}, {pipeline_mode = #tpu.pipeline_mode<synchronous>, transform_indices = @transform_6, window_bounds = array<i64: 32, 32>}, {pipeline_mode = #tpu.pipeline_mode<synchronous>, transform_indices = @transform_7, window_bounds = array<i64: 1, 32>}, {pipeline_mode = #tpu.pipeline_mode<synchronous>, transform_indices = @transform_8, window_bounds = array<i64: 1, 32>}, {pipeline_mode = #tpu.pipeline_mode<synchronous>, transform_indices = @transform_9, window_bounds = array<i64: 1, 32>}, {pipeline_mode = #tpu.pipeline_mode<synchronous>, transform_indices = @transform_10, window_bounds = array<i64: 32, 128>}, {pipeline_mode = #tpu.pipeline_mode<synchronous>, transform_indices = @transform_11, window_bounds = array<i64: 1, 128>}, {pipeline_mode = #tpu.pipeline_mode<synchronous>, transform_indices = @transform_12, window_bounds = array<i64: 128, 32>}, {pipeline_mode = #tpu.pipeline_mode<synchronous>, transform_indices = @transform_13, window_bounds = array<i64: 1, 32>}, {transform_indices = @transform_14, window_bounds = array<i64: 2, 8, 32>}]} {
    %c0 = arith.constant 0 : index
    %c0_0 = arith.constant 0 : index
    %c0_1 = arith.constant 0 : index
    %0 = vector.load %arg1[%c0, %c0_0, %c0_1] : memref<2x8x32xbf16, #tpu.memory_space<vmem>>, vector<2x8x32xbf16>
    %1 = arith.extf %0 : vector<2x8x32xbf16> to vector<2x8x32xf32>
    %2 = vector.shape_cast %1 : vector<2x8x32xf32> to vector<16x32xf32>
    %c0_2 = arith.constant 0 : index
    %c0_3 = arith.constant 0 : index
    %3 = vector.load %arg3[%c0_2, %c0_3] : memref<1x32xf32, #tpu.memory_space<vmem>>, vector<1x32xf32>
    %c0_4 = arith.constant 0 : index
    %c0_5 = arith.constant 0 : index
    %4 = vector.load %arg4[%c0_4, %c0_5] : memref<1x32xf32, #tpu.memory_space<vmem>>, vector<1x32xf32>
    %cst = arith.constant dense<0.000000e+00> : vector<16xf32>
    %5 = vector.multi_reduction <add>, %2, %cst [1] : vector<16x32xf32> to vector<16xf32>
    %6 = vector.shape_cast %5 : vector<16xf32> to vector<16x1xf32>
    %cst_6 = arith.constant 3.200000e+01 : f32
    %7 = vector.broadcast %cst_6 : f32 to vector<16x1xf32>
    %8 = arith.divf %6, %7 : vector<16x1xf32>
    %9 = vector.broadcast %8 : vector<16x1xf32> to vector<16x32xf32>
    %10 = arith.subf %2, %9 : vector<16x32xf32>
    %11 = arith.mulf %10, %10 : vector<16x32xf32>
    %cst_7 = arith.constant dense<0.000000e+00> : vector<16xf32>
    %12 = vector.multi_reduction <add>, %11, %cst_7 [1] : vector<16x32xf32> to vector<16xf32>
    %13 = vector.shape_cast %12 : vector<16xf32> to vector<16x1xf32>
    %cst_8 = arith.constant 3.200000e+01 : f32
    %14 = vector.broadcast %cst_8 : f32 to vector<16x1xf32>
    %15 = arith.divf %13, %14 : vector<16x1xf32>
    %16 = vector.broadcast %8 : vector<16x1xf32> to vector<16x32xf32>
    %17 = arith.subf %2, %16 : vector<16x32xf32>
    %cst_9 = arith.constant 9.99999974E-6 : f32
    %18 = vector.broadcast %cst_9 : f32 to vector<16x1xf32>
    %19 = arith.addf %15, %18 : vector<16x1xf32>
    %20 = math.rsqrt %19 : vector<16x1xf32>
    %21 = vector.broadcast %20 : vector<16x1xf32> to vector<16x32xf32>
    %22 = arith.mulf %17, %21 : vector<16x32xf32>
    %23 = vector.broadcast %3 : vector<1x32xf32> to vector<16x32xf32>
    %24 = arith.mulf %22, %23 : vector<16x32xf32>
    %25 = vector.broadcast %4 : vector<1x32xf32> to vector<16x32xf32>
    %26 = arith.addf %24, %25 : vector<16x32xf32>
    %c0_10 = arith.constant 0 : index
    %c0_11 = arith.constant 0 : index
    %27 = vector.load %arg5[%c0_10, %c0_11] : memref<32x96xbf16, #tpu.memory_space<vmem>>, vector<32x96xbf16>
    %28 = arith.truncf %26 : vector<16x32xf32> to vector<16x32xbf16>
    %cst_12 = arith.constant dense<0.000000e+00> : vector<16x96xf32>
    %29 = tpu.matmul %28, %27, %cst_12 {dimension_numbers = #tpu.dot_dimension_numbers<[1], [0], [0], [1], [0, 0, 1, 1], [], []>} : vector<16x32xbf16>, vector<32x96xbf16>, vector<16x96xf32> -> vector<16x96xf32>
    %c0_13 = arith.constant 0 : index
    %c0_14 = arith.constant 0 : index
    %30 = vector.load %arg6[%c0_13, %c0_14] : memref<1x96xf32, #tpu.memory_space<vmem>>, vector<1x96xf32>
    %31 = vector.broadcast %30 : vector<1x96xf32> to vector<16x96xf32>
    %32 = arith.addf %29, %31 : vector<16x96xf32>
    %33 = vector.extract_strided_slice %32 {offsets = [0, 0], sizes = [16, 32], strides = [1, 1]} : vector<16x96xf32> to vector<16x32xf32>
    %34 = vector.shape_cast %33 : vector<16x32xf32> to vector<16x4x8xf32>
    %35 = tpu.transpose %34, [1, 0, 2] : vector<16x4x8xf32> -> vector<4x16x8xf32>
    %36 = vector.shape_cast %35 : vector<4x16x8xf32> to vector<8x8x8xf32>
    %37 = vector.extract_strided_slice %32 {offsets = [0, 32], sizes = [16, 32], strides = [1, 1]} : vector<16x96xf32> to vector<16x32xf32>
    %38 = vector.shape_cast %37 : vector<16x32xf32> to vector<16x4x8xf32>
    %39 = tpu.transpose %38, [1, 0, 2] : vector<16x4x8xf32> -> vector<4x16x8xf32>
    %40 = vector.shape_cast %39 : vector<4x16x8xf32> to vector<8x8x8xf32>
    %41 = vector.extract_strided_slice %32 {offsets = [0, 64], sizes = [16, 32], strides = [1, 1]} : vector<16x96xf32> to vector<16x32xf32>
    %42 = vector.shape_cast %41 : vector<16x32xf32> to vector<16x4x8xf32>
    %43 = tpu.transpose %42, [1, 0, 2] : vector<16x4x8xf32> -> vector<4x16x8xf32>
    %44 = vector.shape_cast %43 : vector<4x16x8xf32> to vector<8x8x8xf32>
    "tpu.trace_start"() <{level = 10 : i32, message = "nqd,nkd->nqk"}> : () -> ()
    %cst_15 = arith.constant dense<0.000000e+00> : vector<8x8x8xf32>
    %45 = tpu.matmul %36, %40, %cst_15 {dimension_numbers = #tpu.dot_dimension_numbers<[2], [2], [1], [1], [0, 0, 0, 1, 1, 1], [0], [0]>} : vector<8x8x8xf32>, vector<8x8x8xf32>, vector<8x8x8xf32> -> vector<8x8x8xf32>
    "tpu.trace_stop"() : () -> ()
    %c0_16 = arith.constant 0 : index
    %c0_17 = arith.constant 0 : index
    %46 = vector.load %arg2[%c0_16, %c0_17] : memref<8x8xf32, #tpu.memory_space<vmem>>, vector<8x8xf32>
    %47 = vector.shape_cast %46 : vector<8x8xf32> to vector<1x8x8xf32>
    %48 = vector.broadcast %47 : vector<1x8x8xf32> to vector<8x8x8xf32>
    %49 = arith.addf %45, %48 : vector<8x8x8xf32>
    %cst_18 = arith.constant dense<0xFF800000> : vector<8x8xf32>
    %50 = vector.multi_reduction <maximumf>, %49, %cst_18 [2] : vector<8x8x8xf32> to vector<8x8xf32>
    %51 = vector.shape_cast %50 : vector<8x8xf32> to vector<8x8x1xf32>
    %52 = vector.broadcast %51 : vector<8x8x1xf32> to vector<8x8x8xf32>
    %53 = arith.subf %49, %52 : vector<8x8x8xf32>
    %54 = math.exp %53 : vector<8x8x8xf32>
    %cst_19 = arith.constant dense<0.000000e+00> : vector<8x8xf32>
    %55 = vector.multi_reduction <add>, %54, %cst_19 [2] : vector<8x8x8xf32> to vector<8x8xf32>
    %56 = vector.shape_cast %55 : vector<8x8xf32> to vector<8x8x1xf32>
    %57 = tpu.reciprocal %56 {approx = true} : vector<8x8x1xf32> -> vector<8x8x1xf32>
    %58 = vector.broadcast %57 : vector<8x8x1xf32> to vector<8x8x8xf32>
    %59 = arith.mulf %54, %58 : vector<8x8x8xf32>
    "tpu.trace_start"() <{level = 10 : i32, message = "nqk,nkd->nqd"}> : () -> ()
    %cst_20 = arith.constant dense<0.000000e+00> : vector<8x8x8xf32>
    %60 = tpu.matmul %59, %44, %cst_20 {dimension_numbers = #tpu.dot_dimension_numbers<[2], [1], [1], [2], [0, 0, 0, 1, 1, 2], [0], [0]>} : vector<8x8x8xf32>, vector<8x8x8xf32>, vector<8x8x8xf32> -> vector<8x8x8xf32>
    "tpu.trace_stop"() : () -> ()
    %61 = vector.shape_cast %60 : vector<8x8x8xf32> to vector<4x16x8xf32>
    %62 = tpu.transpose %61, [1, 0, 2] : vector<4x16x8xf32> -> vector<16x4x8xf32>
    %63 = vector.shape_cast %62 : vector<16x4x8xf32> to vector<16x32xf32>
    %c0_21 = arith.constant 0 : index
    %c0_22 = arith.constant 0 : index
    %64 = vector.load %arg7[%c0_21, %c0_22] : memref<32x32xbf16, #tpu.memory_space<vmem>>, vector<32x32xbf16>
    %65 = arith.truncf %63 : vector<16x32xf32> to vector<16x32xbf16>
    %cst_23 = arith.constant dense<0.000000e+00> : vector<16x32xf32>
    %66 = tpu.matmul %65, %64, %cst_23 {dimension_numbers = #tpu.dot_dimension_numbers<[1], [0], [0], [1], [0, 0, 1, 1], [], []>} : vector<16x32xbf16>, vector<32x32xbf16>, vector<16x32xf32> -> vector<16x32xf32>
    %67 = arith.addf %2, %66 : vector<16x32xf32>
    %c0_24 = arith.constant 0 : index
    %c0_25 = arith.constant 0 : index
    %68 = vector.load %arg8[%c0_24, %c0_25] : memref<1x32xf32, #tpu.memory_space<vmem>>, vector<1x32xf32>
    %69 = vector.broadcast %68 : vector<1x32xf32> to vector<16x32xf32>
    %70 = arith.addf %67, %69 : vector<16x32xf32>
    %c0_26 = arith.constant 0 : index
    %c0_27 = arith.constant 0 : index
    %71 = vector.load %arg9[%c0_26, %c0_27] : memref<1x32xf32, #tpu.memory_space<vmem>>, vector<1x32xf32>
    %c0_28 = arith.constant 0 : index
    %c0_29 = arith.constant 0 : index
    %72 = vector.load %arg10[%c0_28, %c0_29] : memref<1x32xf32, #tpu.memory_space<vmem>>, vector<1x32xf32>
    %cst_30 = arith.constant dense<0.000000e+00> : vector<16xf32>
    %73 = vector.multi_reduction <add>, %70, %cst_30 [1] : vector<16x32xf32> to vector<16xf32>
    %74 = vector.shape_cast %73 : vector<16xf32> to vector<16x1xf32>
    %cst_31 = arith.constant 3.200000e+01 : f32
    %75 = vector.broadcast %cst_31 : f32 to vector<16x1xf32>
    %76 = arith.divf %74, %75 : vector<16x1xf32>
    %77 = vector.broadcast %76 : vector<16x1xf32> to vector<16x32xf32>
    %78 = arith.subf %70, %77 : vector<16x32xf32>
    %79 = arith.mulf %78, %78 : vector<16x32xf32>
    %cst_32 = arith.constant dense<0.000000e+00> : vector<16xf32>
    %80 = vector.multi_reduction <add>, %79, %cst_32 [1] : vector<16x32xf32> to vector<16xf32>
    %81 = vector.shape_cast %80 : vector<16xf32> to vector<16x1xf32>
    %cst_33 = arith.constant 3.200000e+01 : f32
    %82 = vector.broadcast %cst_33 : f32 to vector<16x1xf32>
    %83 = arith.divf %81, %82 : vector<16x1xf32>
    %84 = vector.broadcast %76 : vector<16x1xf32> to vector<16x32xf32>
    %85 = arith.subf %70, %84 : vector<16x32xf32>
    %cst_34 = arith.constant 9.99999974E-6 : f32
    %86 = vector.broadcast %cst_34 : f32 to vector<16x1xf32>
    %87 = arith.addf %83, %86 : vector<16x1xf32>
    %88 = math.rsqrt %87 : vector<16x1xf32>
    %89 = vector.broadcast %88 : vector<16x1xf32> to vector<16x32xf32>
    %90 = arith.mulf %85, %89 : vector<16x32xf32>
    %91 = vector.broadcast %71 : vector<1x32xf32> to vector<16x32xf32>
    %92 = arith.mulf %90, %91 : vector<16x32xf32>
    %93 = vector.broadcast %72 : vector<1x32xf32> to vector<16x32xf32>
    %94 = arith.addf %92, %93 : vector<16x32xf32>
    %c0_35 = arith.constant 0 : index
    %c0_36 = arith.constant 0 : index
    %95 = vector.load %arg11[%c0_35, %c0_36] : memref<32x128xbf16, #tpu.memory_space<vmem>>, vector<32x128xbf16>
    %96 = arith.truncf %94 : vector<16x32xf32> to vector<16x32xbf16>
    %cst_37 = arith.constant dense<0.000000e+00> : vector<16x128xf32>
    %97 = tpu.matmul %96, %95, %cst_37 {dimension_numbers = #tpu.dot_dimension_numbers<[1], [0], [0], [1], [0, 0, 1, 1], [], []>} : vector<16x32xbf16>, vector<32x128xbf16>, vector<16x128xf32> -> vector<16x128xf32>
    %c0_38 = arith.constant 0 : index
    %c0_39 = arith.constant 0 : index
    %98 = vector.load %arg12[%c0_38, %c0_39] : memref<1x128xf32, #tpu.memory_space<vmem>>, vector<1x128xf32>
    %99 = vector.broadcast %98 : vector<1x128xf32> to vector<16x128xf32>
    %100 = arith.addf %97, %99 : vector<16x128xf32>
    %101 = arith.mulf %100, %100 : vector<16x128xf32>
    %102 = arith.mulf %100, %101 : vector<16x128xf32>
    %cst_40 = arith.constant 4.471500e-02 : f32
    %103 = vector.broadcast %cst_40 : f32 to vector<16x128xf32>
    %104 = arith.mulf %103, %102 : vector<16x128xf32>
    %105 = arith.addf %100, %104 : vector<16x128xf32>
    %cst_41 = arith.constant 0.797884583 : f32
    %106 = vector.broadcast %cst_41 : f32 to vector<16x128xf32>
    %107 = arith.mulf %106, %105 : vector<16x128xf32>
    %108 = math.tanh %107 : vector<16x128xf32>
    %cst_42 = arith.constant 1.000000e+00 : f32
    %109 = vector.broadcast %cst_42 : f32 to vector<16x128xf32>
    %110 = arith.addf %109, %108 : vector<16x128xf32>
    %cst_43 = arith.constant 5.000000e-01 : f32
    %111 = vector.broadcast %cst_43 : f32 to vector<16x128xf32>
    %112 = arith.mulf %111, %110 : vector<16x128xf32>
    %113 = arith.mulf %100, %112 : vector<16x128xf32>
    %c0_44 = arith.constant 0 : index
    %c0_45 = arith.constant 0 : index
    %114 = vector.load %arg13[%c0_44, %c0_45] : memref<128x32xbf16, #tpu.memory_space<vmem>>, vector<128x32xbf16>
    %115 = arith.truncf %113 : vector<16x128xf32> to vector<16x128xbf16>
    %cst_46 = arith.constant dense<0.000000e+00> : vector<16x32xf32>
    %116 = tpu.matmul %115, %114, %cst_46 {dimension_numbers = #tpu.dot_dimension_numbers<[1], [0], [0], [1], [0, 0, 1, 1], [], []>} : vector<16x128xbf16>, vector<128x32xbf16>, vector<16x32xf32> -> vector<16x32xf32>
    %117 = arith.addf %70, %116 : vector<16x32xf32>
    %c0_47 = arith.constant 0 : index
    %c0_48 = arith.constant 0 : index
    %118 = vector.load %arg14[%c0_47, %c0_48] : memref<1x32xf32, #tpu.memory_space<vmem>>, vector<1x32xf32>
    %119 = vector.broadcast %118 : vector<1x32xf32> to vector<16x32xf32>
    %120 = arith.addf %117, %119 : vector<16x32xf32>
    %121 = vector.shape_cast %120 : vector<16x32xf32> to vector<2x8x32xf32>
    %122 = arith.truncf %121 : vector<2x8x32xf32> to vector<2x8x32xbf16>
    %c0_49 = arith.constant 0 : index
    %c0_50 = arith.constant 0 : index
    %c0_51 = arith.constant 0 : index
    %123 = vector.load %arg15[%c0_49, %c0_50, %c0_51] : memref<2x8x32xbf16, #tpu.memory_space<vmem>>, vector<2x8x32xbf16>
    tpu.vector_store %arg15[%c0_49, %c0_50, %c0_51], %122 {strides = array<i32>} : memref<2x8x32xbf16, #tpu.memory_space<vmem>>, vector<2x8x32xbf16>,
    return
  }
  func.func @transform_0(%arg0: i32) -> (i32, i32, i32) {
    %c0_i32 = arith.constant 0 : i32
    %c0_i32_0 = arith.constant 0 : i32
    %c0_i32_1 = arith.constant 0 : i32
    return %arg0, %c0_i32, %c0_i32_0 : i32, i32, i32
  }
  func.func @transform_1(%arg0: i32) -> (i32, i32) {
    %c0_i32 = arith.constant 0 : i32
    %c0_i32_0 = arith.constant 0 : i32
    %c0_i32_1 = arith.constant 0 : i32
    return %c0_i32, %c0_i32_0 : i32, i32
  }
  func.func @transform_2(%arg0: i32) -> (i32, i32) {
    %c0_i32 = arith.constant 0 : i32
    %c0_i32_0 = arith.constant 0 : i32
    %c0_i32_1 = arith.constant 0 : i32
    return %c0_i32, %c0_i32_0 : i32, i32
  }
  func.func @transform_3(%arg0: i32) -> (i32, i32) {
    %c0_i32 = arith.constant 0 : i32
    %c0_i32_0 = arith.constant 0 : i32
    %c0_i32_1 = arith.constant 0 : i32
    return %c0_i32, %c0_i32_0 : i32, i32
  }
  func.func @transform_4(%arg0: i32) -> (i32, i32) {
    %c0_i32 = arith.constant 0 : i32
    %c0_i32_0 = arith.constant 0 : i32
    %c0_i32_1 = arith.constant 0 : i32
    return %c0_i32, %c0_i32_0 : i32, i32
  }
  func.func @transform_5(%arg0: i32) -> (i32, i32) {
    %c0_i32 = arith.constant 0 : i32
    %c0_i32_0 = arith.constant 0 : i32
    %c0_i32_1 = arith.constant 0 : i32
    return %c0_i32, %c0_i32_0 : i32, i32
  }
  func.func @transform_6(%arg0: i32) -> (i32, i32) {
    %c0_i32 = arith.constant 0 : i32
    %c0_i32_0 = arith.constant 0 : i32
    %c0_i32_1 = arith.constant 0 : i32
    return %c0_i32, %c0_i32_0 : i32, i32
  }
  func.func @transform_7(%arg0: i32) -> (i32, i32) {
    %c0_i32 = arith.constant 0 : i32
    %c0_i32_0 = arith.constant 0 : i32
    %c0_i32_1 = arith.constant 0 : i32
    return %c0_i32, %c0_i32_0 : i32, i32
  }
  func.func @transform_8(%arg0: i32) -> (i32, i32) {
    %c0_i32 = arith.constant 0 : i32
    %c0_i32_0 = arith.constant 0 : i32
    %c0_i32_1 = arith.constant 0 : i32
    return %c0_i32, %c0_i32_0 : i32, i32
  }
  func.func @transform_9(%arg0: i32) -> (i32, i32) {
    %c0_i32 = arith.constant 0 : i32
    %c0_i32_0 = arith.constant 0 : i32
    %c0_i32_1 = arith.constant 0 : i32
    return %c0_i32, %c0_i32_0 : i32, i32
  }
  func.func @transform_10(%arg0: i32) -> (i32, i32) {
    %c0_i32 = arith.constant 0 : i32
    %c0_i32_0 = arith.constant 0 : i32
    %c0_i32_1 = arith.constant 0 : i32
    return %c0_i32, %c0_i32_0 : i32, i32
  }
  func.func @transform_11(%arg0: i32) -> (i32, i32) {
    %c0_i32 = arith.constant 0 : i32
    %c0_i32_0 = arith.constant 0 : i32
    %c0_i32_1 = arith.constant 0 : i32
    return %c0_i32, %c0_i32_0 : i32, i32
  }
  func.func @transform_12(%arg0: i32) -> (i32, i32) {
    %c0_i32 = arith.constant 0 : i32
    %c0_i32_0 = arith.constant 0 : i32
    %c0_i32_1 = arith.constant 0 : i32
    return %c0_i32, %c0_i32_0 : i32, i32
  }
  func.func @transform_13(%arg0: i32) -> (i32, i32) {
    %c0_i32 = arith.constant 0 : i32
    %c0_i32_0 = arith.constant 0 : i32
    %c0_i32_1 = arith.constant 0 : i32
    return %c0_i32, %c0_i32_0 : i32, i32
  }
  func.func @transform_14(%arg0: i32) -> (i32, i32, i32) {
    %c0_i32 = arith.constant 0 : i32
    %c0_i32_0 = arith.constant 0 : i32
    %c0_i32_1 = arith.constant 0 : i32
    return %arg0, %c0_i32, %c0_i32_0 : i32, i32, i32
  }
}

</mosaic_0001>

<bundles_post_ra>
// kernel: tpu_custom_call.1
= control target key start
LH: loop header
LB: loop body
LE: loop exit
PB: predicated region body
PF: predicated region fallthrough
CT: control target
= control target key end

     0   :  { %s4569_s0 = inlined_call_operand.vmem [shape: bf16[4,8,32], index: 0, kind: input, shape index: {}]   ;;  %s4570_s1 = inlined_call_operand.vmem [shape: f32[8,8], index: 1, kind: input, shape index: {}]   ;;  %s4571_s2 = inlined_call_operand.vmem [shape: f32[1,32], index: 2, kind: input, shape index: {}]   ;;  %s4572_s3 = inlined_call_operand.vmem [shape: f32[1,32], index: 3, kind: input, shape index: {}]   ;;  %s4573_s4 = inlined_call_operand.vmem [shape: bf16[32,96], index: 4, kind: input, shape index: {}]   ;;  %s4574_s5 = inlined_call_operand.vmem [shape: f32[1,96], index: 5, kind: input, shape index: {}]   ;;  %s4575_s6 = inlined_call_operand.vmem [shape: bf16[32,32], index: 6, kind: input, shape index: {}]   ;;  %s4576_s7 = inlined_call_operand.vmem [shape: f32[1,32], index: 7, kind: input, shape index: {}]   ;;  %s4577_s8 = inlined_call_operand.vmem [shape: f32[1,32], index: 8, kind: input, shape index: {}]   ;;  %s4578_s9 = inlined_call_operand.vmem [shape: f32[1,32], index: 9, kind: input, shape index: {}]   ;;  %s4579_s10 = inlined_call_operand.vmem [shape: bf16[32,128], index: 10, kind: input, shape index: {}]   ;;  %s4580_s11 = inlined_call_operand.vmem [shape: f32[1,128], index: 11, kind: input, shape index: {}]   ;;  %s4581_s12 = inlined_call_operand.vmem [shape: bf16[128,32], index: 12, kind: input, shape index: {}]   ;;  %s4582_s13 = inlined_call_operand.vmem [shape: f32[1,32], index: 13, kind: input, shape index: {}]   ;;  %s4583_s14 = inlined_call_operand.hbm [shape: bf16[4,8,32], index: 14, kind: output, shape index: {}]  }
   0x1   :  { %4585 = sst [smem:[#allocation5_spill]] %s4569_s0 }
   0x2   :  { %4586 = sst [smem:[#allocation6_spill]] %s4570_s1 }
   0x3   :  { %4587 = sst [smem:[#allocation7_spill]] %s4571_s2 }
   0x4   :  { %19 = vsyncpa [#allocation3], 0 }
   0x5   :  { %21 = vsyncpa [#allocation3 + $0x1], 0  ;;  %s3992_s29 = smov 0   ;;  %s3994_s30 = smov 0  }
   0x6   :  { %s3996_s15 = smov 0   ;;  %s3998_s16 = smov 0  }
   0x7 LB: > { %s4013_s17 = sadd.s32 4294967295, %s3901_s16   ;;  %s3458_s18 = sadd.s32 4294967294, %s3901_s16   ;;  %s3901_s16 = sphi %s3998_s16, %s4597_s16   ;;  %s3897_s15 = sphi %s3996_s15, %s4596_s15   ;;  %s3893_s30 = sphi %s3994_s30, %s4595_s30   ;;  %s3889_s29 = sphi %s3992_s29, %s4594_s29  }
   0x8   : > { %s4017_s19 = sadd.s32 1, %s3901_s16   ;;  %s333_s20 = sadd.s32 1, %s3897_s15 }
   0x9   : > { %s330_s21 = ssub.s32 %s3901_s16, %s4017_s19  ;;  %p343_p0 = scmp.ne.s32.totalorder %s3897_s15, %s3893_s30 }
   0xa   : > { %p331_p1 = scmp.eq.s32.totalorder %s330_s21, 0  ;;  %p344_p2 = scmp.eq.s32.totalorder %s4013_s17, 1 }
   0xb   : > { %p349_p3 = scmp.ne.s32.totalorder %s3893_s30, %s3889_s29  ;;  %p350_p4 = scmp.eq.s32.totalorder %s3458_s18, 1 }
   0xc   : > { %s4028_s22 = scalar_select %p331_p1, %s3897_s15, %s333_s20  }
   0xd   : > { %p4030_p5 = por %p344_p2, %p343_p0  ;;  %p4034_p6 = por %p350_p4, %p349_p3 }
   0xe   : > { %p3461_p7 = scmp.ge.s32.totalorder %s3901_s16, 1  ;;  %p416_p8 = scmp.lt.s32.totalorder %s3901_s16, 3 }
  0x10   : > { %p417_p9 = pnand %p3461_p7, %p416_p8 }
  0x11   : > { %s3463_s25 = sshll.u32 (!%p417_p9), %s4013_s17, 1  ;;  %s4590_s0 = sld [smem:[#allocation5_spill]] (!%p417_p9)  ;;  %vm476_vm0 = vcmask (!%p417_p9), 261120   ;;  %v3781_v15 = vld [vmem:[%s4573_s4] sm:$0xff] (!%p417_p9)   ;;  %v3903_v16 = vmov (!%p417_p9), 0.0   ;;  %v3782_v17 = vld [vmem:[%s4573_s4 + $0x8] sm:$0xff] (!%p417_p9)   ;;  %v613_v50 = vlaneseq (!%p417_p9) }
  0x12   : > { %420 = sbr.rel (%p417_p9) target bundleno = 2744 (0xab8), region = 76  ;;  %p463_p10 = scmp.lt.s32.totalorder (!%p417_p9), %s3463_s25, 3  ;;  %3590 = vmatprep.subr.bf16.mxu0 (!%p417_p9), %v3903_v16  ;;  %3603 = vmatprep.subr.mxu1 (!%p417_p9), %v3903_v16  ;;  %vm3904_vm1 = vmmov (!%p417_p9), 0   ;;  %v3466_v30 = vld [vmem:[%s4572_s3] ss:$0 sm:$0xff] (!%p417_p9)  ;;  %vm1473_vm2 = vcmask (!%p417_p9), 64512  }
  0x13   : > { %3591 = vmatpush3.bf16.msra.mxu0 (!%p417_p9), %v3781_v15  ;;  %3594 = vmatprep.mubr.msk.bf16.mxu0 (!%p417_p9), %vm3904_vm1, %v3903_v16  ;;  %s4591_s2 = sld [smem:[#allocation7_spill]] (!%p417_p9)  ;;  %v3467_v35 = vld [vmem:[%s4574_s5] ss:$0 sm:$0xff] (!%p417_p9)  ;;  %s3906_s27 = smov (!%p417_p9), 120   ;;  %v3909_v48 = vmov (!%p417_p9), 1983009808  }
  0x14   : > { %3592 = vmatprep.subr.bf16.mxu0 (!%p417_p9), %v3903_v16  ;;  %3605 = vmatprep.mubr.msk.f32.mxu1 (!%p417_p9), %vm3904_vm1, %v3903_v16  ;;  %s3907_s28 = smov (!%p417_p9), 104   ;;  %v611_v49 = vunpack.c.l.s4 (!%p417_p9), %v3909_v48  ;;  %v614_v52 = vshrl.u32 (!%p417_p9), %v613_v50, 7  ;;  %v3910_v53 = vmov (!%p417_p9), 1934713408   ;;  %s4592_s1 = sld [smem:[#allocation6_spill]] (!%p417_p9)  ;;  %vm3052_vm3 = vcmask (!%p417_p9), 130048  }
  0x15   : > { %v643_v54 = vunpack.c.l.s4 (!%p417_p9), %v3910_v53  ;;  %s3912_s20 = smov (!%p417_p9), 16   ;;  %s3913_s21 = smov (!%p417_p9), 8   ;;  %vm3055_vm4 = vcmask (!%p417_p9), 195584   ;;  %vm3379_vm5 = vcmask (!%p417_p9), 257024  }
  0x16   : > { %v612_v51 = vunpack.c.0.s8 (!%p417_p9), %v611_v49 }
  0x17   : > { %3593 = vmatpush3.bf16.msra.mxu0 (!%p417_p9), %v3782_v17  ;;  %v644_v60 = vunpack.c.0.s8 (!%p417_p9), %v643_v54 }
  0x18   : > { %3598 = vmatprep.subr.mxu0 (!%p417_p9), %v3903_v16  ;;  %v4116_v57 = vsub.s32 (!%p417_p9), %v612_v51, %v614_v52 }
  0x19   : > { %s4599_s25 = smov (!%p463_p10, %s3463_s25), 3  ;;  %v3465_v26 = vld [vmem:[%s4591_s2] ss:$0 sm:$0xff] }
  0x1a   : > { %s3464_s26 = sshll.u32 %s4599_s25, 2  ;;  %s4584_s25 = smov 64  }
  0x1b   : > { %s466_s18 = scalar_lea.vmem %s4590_s0, %s3464_s26  ;;  %s3905_s26 = smov 112  }
  0x1c   : > { %v3537_v0 = vld [vmem:[%s466_s18] sm:$0xff]   ;;  %s3908_s18 = smov 96   ;;  %s459_s0 = sand.u32 1, %s3893_s30  }
  0x1d   : > { %v4044_v1 = vunpack.c.l.bf16 %v3537_v0  ;;  %v4046_v2 = vunpack.c.h.bf16 %v3537_v0 }
  0x1f   : > { %v477_v3 = vsel %vm476_vm0, %v4044_v1, 0.0  ;;  %v480_v4 = vsel %vm476_vm0, %v4046_v2, 0.0 }
  0x20   : > { %478 = vadd.xlane.f32.xlu0 %v477_v3  ;;  %v4126_v3 = vsub.s32 %v644_v60, %v614_v52 }
  0x24   : > { %481 = vadd.xlane.f32.xlu0 %v480_v4 }
  0xad   : > { %v479_v5 = vpop.xlane.xlu0 %478 }
  0xae   : > { %v484_v6 = vmul.f32 0.03125, %v479_v5 }
  0xb0   : > { %v486_v7 = vsub.f32 %v4044_v1, %v484_v6 }
  0xb1   : > { %v482_v8 = vpop.xlane.xlu0 %481 }
  0xb2   : > { %v485_v9 = vmul.f32 0.03125, %v482_v8  ;;  %v488_v10 = vmul.f32 %v486_v7, %v486_v7 }
  0xb4   : > { %v487_v11 = vsub.f32 %v4046_v2, %v485_v9  ;;  %v490_v12 = vsel %vm476_vm0, %v488_v10, 0.0 }
  0xb5   : > { %491 = vadd.xlane.f32.xlu1 %v490_v12 }
  0xb6   : > { %v489_v13 = vmul.f32 %v487_v11, %v487_v11 }
  0xb8   : > { %v493_v14 = vsel %vm476_vm0, %v489_v13, 0.0 }
  0xb9   : > { %494 = vadd.xlane.f32.xlu1 %v493_v14 }
 0x142   : > { %v492_v18 = vpop.xlane.xlu1 %491 }
 0x143   : > { %v496_v19 = vmul.f32 0.03125, %v492_v18 }
 0x145   : > { %v498_v20 = vadd.f32 1e-05, %v496_v19 }
 0x146   : > { %v495_v21 = vpop.xlane.xlu1 %494 }
 0x147   : > { %3795 = vrsqrt.f32 %v498_v20  ;;  %v497_v22 = vmul.f32 0.03125, %v495_v21 }
 0x149   : > { %v499_v23 = vadd.f32 1e-05, %v497_v22 }
 0x14b   : > { %3797 = vrsqrt.f32 %v499_v23 }
 0x151   : > { %v3796_v24 = vpop.eup %3795 }
 0x152   : > { %v502_v25 = vmul.f32 %v3796_v24, %v486_v7 }
 0x154   : > { %v510_v29 = vmul.f32 %v3465_v26, %v502_v25 }
 0x155   : > { %v3798_v27 = vpop.eup %3797 }
 0x156   : > { %v503_v28 = vmul.f32 %v3798_v27, %v487_v11  ;;  %v518_v32 = vadd.f32 %v3466_v30, %v510_v29 }
 0x158   : > { %v511_v31 = vmul.f32 %v3465_v26, %v503_v28 }
 0x15a   : > { %v519_v33 = vadd.f32 %v3466_v30, %v511_v31 }
 0x15c   : > { %v524_v34 = vpack.c.bf16 %v519_v33, %v518_v32 }
 0x15e   : > { %3595 = vmatmul.mubr.msk.bf16.vlgmr.msra.gmra.mrb[0].mxu0 %vm476_vm0, %v524_v34 }
 0x15f   : > { %3600 = vmatprep.mubr.msk.f32.mxu0 %vm3904_vm1, %v3903_v16 }
 0x231   : > { %v581_v36 = vpop.f32.mrb[0].mxu0 }
 0x232   : > { %v4082_v37 = vadd.f32 %v3467_v35, %v581_v36  ;;  %v3596_v38 = vpop.f32.mrb[1].mxu0 }
 0x233   : > { %v584_v39 = vpop.f32.mrb[2].mxu0 }
 0x234   : > { %596 = vrot.lane.b32.xlu1 %v4082_v37, %s3905_s26  ;;  %590 = vrot.lane.b32.xlu0 %v4082_v37, %s3906_s27  ;;  %v3597_v40 = vpop.f32.mrb[3].mxu0  ;;  %v4086_v41 = vadd.f32 %v3467_v35, %v584_v39 }
 0x238   : > { %602 = vrot.lane.b32.xlu0 %v4082_v37, %s3907_s28  ;;  %592 = vrot.lane.b32.xlu1 %v4086_v41, %s3906_s27 }
 0x23c   : > { %880 = vrot.lane.b32.xlu0 %v4082_v37, %s3908_s18  ;;  %598 = vrot.lane.b32.xlu1 %v4086_v41, %s3905_s26  ;;  %s3914_s26 = smov 24  }
 0x240   : > { %604 = vrot.lane.b32.xlu1 %v4086_v41, %s3907_s28  ;;  %s3462_s28 = sshll.u32 %s459_s0, 3 }
 0x244   : > { %882 = vrot.lane.b32.xlu1 %v4086_v41, %s3908_s18 }
 0x2a6   : > { %v4094_v42 = vpop.permute.xlu1 %596  ;;  %v4096_v43 = vpop.permute.xlu0 %590 }
 0x2a7   : > { %884 = vrot.lane.b32.xlu0 %v4096_v43, %s3908_s18  ;;  %v608_v58 = vcombine.low %v4082_v37, %v4094_v42  ;;  %v609_v59 = vcombine.high %v4082_v37, %v4094_v42 }
 0x2a9   : > { %v616_v63 = vrot.slane %v608_v58, %v4116_v57  ;;  %v623_v0 = vrot.slane %v609_v59, %v4116_v57 }
 0x2aa   : > { %v4099_v44 = vpop.permute.xlu1 %592  ;;  %v4103_v45 = vpop.permute.xlu0 %602 }
 0x2ab   : > { %888 = vrot.lane.b32.xlu0 %v4094_v42, %s3908_s18  ;;  %886 = vrot.lane.b32.xlu1 %v4099_v44, %s3908_s18  ;;  %v624_v55 = vcombine.low %v4096_v43, %v4103_v45  ;;  %v625_v56 = vcombine.high %v4096_v43, %v4103_v45 }
 0x2ad   : > { %v632_v61 = vrot.slane %v624_v55, %v4116_v57  ;;  %v639_v62 = vrot.slane %v625_v56, %v4116_v57 }
 0x2ae   : > { %v4105_v46 = vpop.permute.xlu1 %598  ;;  %v881_v9 = vpop.permute.xlu0 %880 }
 0x2af   : > { %892 = vrot.lane.b32.xlu0 %v4103_v45, %s3908_s18  ;;  %890 = vrot.lane.b32.xlu1 %v4105_v46, %s3908_s18  ;;  %v640_v4 = vcombine.low %v616_v63, %v632_v61  ;;  %v641_v5 = vcombine.high %v616_v63, %v632_v61  ;;  %v656_v6 = vcombine.low %v623_v0, %v639_v62 }
 0x2b0   : > { %v657_v7 = vcombine.high %v623_v0, %v639_v62  ;;  %v676_v10 = vcombine.low %v4086_v41, %v4105_v46  ;;  %v677_v14 = vcombine.high %v4086_v41, %v4105_v46 }
 0x2b1   : > { %v648_v12 = vrot.slane %v640_v4, %v4126_v3  ;;  %v655_v13 = vrot.slane %v641_v5, %v4126_v3  ;;  %v664_v15 = vrot.slane %v656_v6, %v4126_v3 }
 0x2b2   : > { %v4109_v47 = vpop.permute.xlu1 %604  ;;  %v671_v17 = vrot.slane %v657_v7, %v4126_v3  ;;  %v684_v19 = vrot.slane %v676_v10, %v4116_v57  ;;  %v691_v25 = vrot.slane %v677_v14, %v4116_v57 }
 0x2b3   : > { %894 = vrot.lane.b32.xlu1 %v4109_v47, %s3908_s18  ;;  %v692_v8 = vcombine.low %v4099_v44, %v4109_v47  ;;  %v693_v11 = vcombine.high %v4099_v44, %v4109_v47  ;;  %v744_v23 = vcombine.low %v648_v12, %v655_v13  ;;  %v3471_v24 = vcombine.high %v648_v12, %v655_v13 }
 0x2b4   : > { %v760_v26 = vcombine.low %v664_v15, %v671_v17  ;;  %v3472_v27 = vcombine.high %v664_v15, %v671_v17 }
 0x2b5   : > { %v700_v18 = vrot.slane %v692_v8, %v4116_v57  ;;  %v707_v20 = vrot.slane %v693_v11, %v4116_v57  ;;  %v4145_v34 = vrot.slane %v744_v23, %v4116_v57  ;;  %v4148_v35 = vrot.slane %v3471_v24, %v4116_v57 }
 0x2b6   : > { %v883_v21 = vpop.permute.xlu1 %882  ;;  %v4151_v36 = vrot.slane %v760_v26, %v4116_v57  ;;  %v4154_v38 = vrot.slane %v3472_v27, %v4116_v57 }
 0x2b7   : > { %v708_v28 = vcombine.low %v684_v19, %v700_v18  ;;  %v709_v29 = vcombine.high %v684_v19, %v700_v18  ;;  %v724_v30 = vcombine.low %v691_v25, %v707_v20  ;;  %v725_v31 = vcombine.high %v691_v25, %v707_v20 }
 0x2b8   : > { %v776_v59 = vcombine.low %v4145_v34, %v4148_v35  ;;  %v792_v60 = vcombine.low %v4151_v36, %v4154_v38 }
 0x2b9   : > { %v716_v39 = vrot.slane %v708_v28, %v4126_v3  ;;  %v723_v40 = vrot.slane %v709_v29, %v4126_v3  ;;  %v732_v50 = vrot.slane %v724_v30, %v4126_v3  ;;  %v739_v51 = vrot.slane %v725_v31, %v4126_v3 }
 0x2bb   : > { %v812_v56 = vcombine.low %v716_v39, %v723_v40  ;;  %v3473_v58 = vcombine.high %v716_v39, %v723_v40  ;;  %v828_v4 = vcombine.low %v732_v50, %v739_v51  ;;  %v3474_v5 = vcombine.high %v732_v50, %v739_v51 }
 0x2bd   : > { %v4169_v15 = vrot.slane %v812_v56, %v4116_v57  ;;  %v4172_v17 = vrot.slane %v3473_v58, %v4116_v57  ;;  %v835_v56 = vrot.slane %v828_v4, %v4116_v57  ;;  %v843_v58 = vrot.slane %v3474_v5, %v4116_v57 }
 0x319   : > { %v885_v22 = vpop.permute.xlu0 %884 }
 0x31d   : > { %v889_v32 = vpop.permute.xlu0 %888  ;;  %v887_v33 = vpop.permute.xlu1 %886 }
 0x31e   : > { %v904_v48 = vcombine.low %v881_v9, %v889_v32  ;;  %v905_v49 = vcombine.high %v881_v9, %v889_v32 }
 0x320   : > { %v912_v61 = vrot.slane %v904_v48, %v4116_v57  ;;  %v919_v62 = vrot.slane %v905_v49, %v4116_v57 }
 0x321   : > { %v893_v52 = vpop.permute.xlu0 %892  ;;  %v891_v55 = vpop.permute.xlu1 %890 }
 0x322   : > { %v920_v53 = vcombine.low %v885_v22, %v893_v52  ;;  %v921_v54 = vcombine.high %v885_v22, %v893_v52  ;;  %v972_v6 = vcombine.low %v883_v21, %v891_v55  ;;  %v973_v7 = vcombine.high %v883_v21, %v891_v55 }
 0x324   : > { %v928_v63 = vrot.slane %v920_v53, %v4116_v57  ;;  %v935_v0 = vrot.slane %v921_v54, %v4116_v57  ;;  %v980_v22 = vrot.slane %v972_v6, %v4116_v57  ;;  %v987_v23 = vrot.slane %v973_v7, %v4116_v57 }
 0x325   : > { %v895_v12 = vpop.permute.xlu1 %894 }
 0x326   : > { %v936_v8 = vcombine.low %v912_v61, %v928_v63  ;;  %v937_v9 = vcombine.high %v912_v61, %v928_v63  ;;  %v952_v10 = vcombine.low %v919_v62, %v935_v0  ;;  %v953_v11 = vcombine.high %v919_v62, %v935_v0 }
 0x327   : > { %v988_v13 = vcombine.low %v887_v33, %v895_v12  ;;  %v989_v14 = vcombine.high %v887_v33, %v895_v12 }
 0x328   : > { %v944_v18 = vrot.slane %v936_v8, %v4126_v3  ;;  %v951_v19 = vrot.slane %v937_v9, %v4126_v3  ;;  %v960_v20 = vrot.slane %v952_v10, %v4126_v3  ;;  %v967_v21 = vrot.slane %v953_v11, %v4126_v3 }
 0x329   : > { %v996_v24 = vrot.slane %v988_v13, %v4116_v57  ;;  %v1003_v25 = vrot.slane %v989_v14, %v4116_v57  ;;  %v784_v8 = vrot.slane %v776_v59, %v4126_v3  ;;  %v800_v9 = vrot.slane %v792_v60, %v4126_v3 }
 0x32a   : > { %v1040_v26 = vcombine.low %v944_v18, %v951_v19  ;;  %v3475_v27 = vcombine.high %v944_v18, %v951_v19  ;;  %v1056_v28 = vcombine.low %v960_v20, %v967_v21  ;;  %v3476_v29 = vcombine.high %v960_v20, %v967_v21 }
 0x32b   : > { %v1004_v30 = vcombine.low %v980_v22, %v996_v24  ;;  %v1005_v31 = vcombine.high %v980_v22, %v996_v24  ;;  %v1020_v32 = vcombine.low %v987_v23, %v1003_v25  ;;  %v1021_v33 = vcombine.high %v987_v23, %v1003_v25 }
 0x32c   : > { %v1047_v39 = vrot.slane %v1040_v26, %v4116_v57  ;;  %v1055_v40 = vrot.slane %v3475_v27, %v4116_v57  ;;  %v1063_v48 = vrot.slane %v1056_v28, %v4116_v57  ;;  %v1071_v49 = vrot.slane %v3476_v29, %v4116_v57 }
 0x32d   : > { %v1012_v50 = vrot.slane %v1004_v30, %v4126_v3  ;;  %v1019_v51 = vrot.slane %v1005_v31, %v4126_v3  ;;  %v1028_v52 = vrot.slane %v1020_v32, %v4126_v3  ;;  %v1035_v53 = vrot.slane %v1021_v33, %v4126_v3 }
 0x32e   : > { %v1072_v54 = vcombine.low %v1047_v39, %v1055_v40  ;;  %v1088_v55 = vcombine.low %v1063_v48, %v1071_v49  ;;  %v844_v13 = vcombine.low %v4169_v15, %v4172_v17  ;;  %v860_v14 = vcombine.low %v835_v56, %v843_v58 }
 0x32f   : > { %v1108_v61 = vcombine.low %v1012_v50, %v1019_v51  ;;  %v3477_v62 = vcombine.high %v1012_v50, %v1019_v51  ;;  %v1124_v63 = vcombine.low %v1028_v52, %v1035_v53  ;;  %v3478_v0 = vcombine.high %v1028_v52, %v1035_v53 }
 0x330   : > { %v1080_v6 = vrot.slane %v1072_v54, %v4126_v3  ;;  %v1096_v7 = vrot.slane %v1088_v55, %v4126_v3  ;;  %v808_v59 = vcombine.low %v784_v8, %v800_v9  ;;  %v845_v23 = vcombine.high %v4169_v15, %v4172_v17 }
 0x331   : > { %v1115_v10 = vrot.slane %v1108_v61, %v4116_v57  ;;  %v1123_v11 = vrot.slane %v3477_v62, %v4116_v57  ;;  %v1131_v4 = vrot.slane %v1124_v63, %v4116_v57  ;;  %v1139_v5 = vrot.slane %v3478_v0, %v4116_v57  ;;  %v1472_v62 = vld [vmem:[%s4592_s1] sm:$0xff] }
 0x332   : > { %v1104_v12 = vcombine.low %v1080_v6, %v1096_v7  ;;  %v861_v24 = vcombine.high %v835_v56, %v843_v58  ;;  %v1073_v25 = vcombine.high %v1047_v39, %v1055_v40  ;;  %v1089_v26 = vcombine.high %v1063_v48, %v1071_v49 }
 0x333   : > { %v1140_v18 = vcombine.low %v1115_v10, %v1123_v11  ;;  %v1141_v19 = vcombine.high %v1115_v10, %v1123_v11  ;;  %v1156_v20 = vcombine.low %v1131_v4, %v1139_v5  ;;  %v1157_v21 = vcombine.high %v1131_v4, %v1139_v5 }
 0x334   : > { %3599 = vmatpush3.xpose.msk.msra.mxu0 %vm1473_vm2, %v1104_v12  ;;  %v852_v27 = vrot.slane %v844_v13, %v4126_v3  ;;  %v868_v28 = vrot.slane %v860_v14, %v4126_v3  ;;  %v859_v15 = vrot.slane %v845_v23, %v4126_v3  ;;  %v777_v17 = vcombine.high %v4145_v34, %v4148_v35 }
 0x335   : > { %3613 = vmatprep.subr.mxu0 %v3903_v16  ;;  %v1148_v60 = vrot.slane %v1140_v18, %v4126_v3  ;;  %v1164_v22 = vrot.slane %v1156_v20, %v4126_v3  ;;  %v1155_v31 = vrot.slane %v1141_v19, %v4126_v3  ;;  %v1171_v32 = vrot.slane %v1157_v21, %v4126_v3 }
 0x336   : > { %v793_v33 = vcombine.high %v4151_v36, %v4154_v38  ;;  %v876_v39 = vcombine.low %v852_v27, %v868_v28  ;;  %v877_v40 = vcombine.high %v852_v27, %v868_v28  ;;  %v875_v48 = vrot.slane %v861_v24, %v4126_v3 }
 0x337   : > { %3601 = vmatmul.mubr.msk.f32.vlgmr.msra.gmra.mrb[4].mxu0 %vm1473_vm2, %v808_v59  ;;  %v1172_v29 = vcombine.low %v1148_v60, %v1164_v22  ;;  %v1173_v30 = vcombine.high %v1148_v60, %v1164_v22  ;;  %v1105_v49 = vcombine.high %v1080_v6, %v1096_v7  ;;  %v1174_v50 = vcombine.low %v1155_v31, %v1171_v32 }
 0x338   : > { %3615 = vmatprep.mubr.msk.f32.mxu0 %vm3904_vm1, %v3903_v16  ;;  %v1087_v51 = vrot.slane %v1073_v25, %v4126_v3  ;;  %v1103_v52 = vrot.slane %v1089_v26, %v4126_v3  ;;  %v791_v34 = vrot.slane %v777_v17, %v4126_v3  ;;  %v809_v35 = vcombine.high %v784_v8, %v800_v9 }
 0x339   : > { %3604 = vmatpush3.xpose.msk.msra.mxu1 %vm1473_vm2, %v1172_v29  ;;  %3614 = vmatpush3.xpose.msk.msra.mxu0 %vm1473_vm2, %v1173_v30  ;;  %v878_v36 = vcombine.low %v859_v15, %v875_v48  ;;  %v807_v38 = vrot.slane %v793_v33, %v4126_v3  ;;  %v1175_v54 = vcombine.high %v1155_v31, %v1171_v32 }
 0x33a   : > { %3608 = vmatprep.subr.mxu1 %v3903_v16  ;;  %3623 = vmatprep.subr.mxu0 %v3903_v16  ;;  %v1106_v53 = vcombine.low %v1087_v51, %v1103_v52  ;;  %v879_v56 = vcombine.high %v859_v15, %v875_v48  ;;  %v1107_v58 = vcombine.high %v1087_v51, %v1103_v52 }
 0x33b   : > { %v810_v55 = vcombine.low %v791_v34, %v807_v38  ;;  %v811_v61 = vcombine.high %v791_v34, %v807_v38 }
 0x33c   : > { %3606 = vmatmul.mubr.msk.f32.vlgmr.msra.gmra.mrb[0].mxu1 %vm1473_vm2, %v876_v39  ;;  %3616 = vmatmul.mubr.msk.f32.vlgmr.msra.gmra.mrb[6].mxu0 %vm1473_vm2, %v877_v40 }
 0x33d   : > { %3609 = vmatpush3.xpose.msk.msra.mxu1 %vm1473_vm2, %v1105_v49  ;;  %3624 = vmatpush3.xpose.msk.msra.mxu0 %vm1473_vm2, %v1174_v50 }
 0x33e   : > { %3610 = vmatprep.mubr.msk.f32.mxu1 %vm3904_vm1, %v3903_v16  ;;  %3625 = vmatprep.mubr.msk.f32.mxu0 %vm3904_vm1, %v3903_v16 }
 0x33f   : > { %3618 = vmatprep.subr.mxu1 %v3903_v16  ;;  %3633 = vmatprep.subr.mxu0 %v3903_v16 }
 0x340   : > { %3611 = vmatmul.mubr.msk.f32.vlgmr.msra.gmra.mrb[2].mxu1 %vm1473_vm2, %v809_v35  ;;  %3626 = vmatmul.mubr.msk.f32.vlgmr.msra.gmra.mrb[8].mxu0 %vm1473_vm2, %v878_v36 }
 0x341   : > { %3619 = vmatpush3.xpose.msk.msra.mxu1 %vm1473_vm2, %v1106_v53  ;;  %3634 = vmatpush3.xpose.msk.msra.mxu0 %vm1473_vm2, %v1175_v54 }
 0x342   : > { %3620 = vmatprep.mubr.msk.f32.mxu1 %vm3904_vm1, %v3903_v16  ;;  %3635 = vmatprep.mubr.msk.f32.mxu0 %vm3904_vm1, %v3903_v16 }
 0x343   : > { %3628 = vmatprep.subr.mxu1 %v3903_v16  ;;  %3643 = vmatprep.subr.mxu0 %v3903_v16 }
 0x344   : > { %3621 = vmatmul.mubr.msk.f32.vlgmr.msra.gmra.mrb[4].mxu1 %vm1473_vm2, %v810_v55  ;;  %3636 = vmatmul.mubr.msk.f32.vlgmr.msra.gmra.mrb[10].mxu0 %vm1473_vm2, %v879_v56 }
 0x345   : > { %3629 = vmatpush3.xpose.msk.msra.mxu1 %vm1473_vm2, %v1107_v58  ;;  %3630 = vmatprep.mubr.msk.f32.mxu1 %vm3904_vm1, %v3903_v16 }
 0x346   : > { %3638 = vmatprep.subr.mxu1 %v3903_v16  ;;  %3645 = vmatprep.mubr.msk.f32.mxu0 %vm3904_vm1, %v3903_v16 }
 0x348   : > { %3631 = vmatmul.mubr.msk.f32.vlgmr.msra.gmra.mrb[6].mxu1 %vm1473_vm2, %v811_v61 }
 0x349   : > { %3640 = vmatprep.mubr.msk.f32.mxu1 %vm3904_vm1, %v3903_v16 }
 0x40a   : > { %v1546_v63 = vpop.f32.mrb[4].mxu0 }
 0x40b   : > { %v1547_v0 = vadd.f32 %v1546_v63, %v1472_v62  ;;  %v3602_v6 = vpop.f32.mrb[5].mxu0 }
 0x40d   : > { %v2082_v7 = vsel %vm1473_vm2, %v1547_v0, -inf }
 0x40e   : > { %2083 = vmax.xlane.f32.xlu0 %v2082_v7 }
 0x40f   : > { %v1622_v8 = vpop.f32.mrb[0].mxu1  ;;  %v1774_v9 = vpop.f32.mrb[6].mxu0 }
 0x410   : > { %v1623_v10 = vadd.f32 %v1622_v8, %v1472_v62  ;;  %v1775_v11 = vadd.f32 %v1774_v9, %v1472_v62  ;;  %v3607_v4 = vpop.f32.mrb[1].mxu1  ;;  %v3617_v5 = vpop.f32.mrb[7].mxu0 }
 0x412   : > { %v2085_v12 = vsel %vm1473_vm2, %v1623_v10, -inf  ;;  %v2091_v13 = vsel %vm1473_vm2, %v1775_v11, -inf }
 0x413   : > { %2086 = vmax.xlane.f32.xlu1 %v2085_v12  ;;  %v1698_v14 = vpop.f32.mrb[2].mxu1  ;;  %2092 = vmax.xlane.f32.xlu0 %v2091_v13  ;;  %v1926_v18 = vpop.f32.mrb[8].mxu0 }
 0x414   : > { %v1699_v19 = vadd.f32 %v1698_v14, %v1472_v62  ;;  %v1927_v20 = vadd.f32 %v1926_v18, %v1472_v62  ;;  %v3612_v21 = vpop.f32.mrb[3].mxu1  ;;  %v3627_v59 = vpop.f32.mrb[9].mxu0 }
 0x416   : > { %v2088_v60 = vsel %vm1473_vm2, %v1699_v19, -inf  ;;  %v2097_v22 = vsel %vm1473_vm2, %v1927_v20, -inf }
 0x417   : > { %v1850_v23 = vpop.f32.mrb[4].mxu1  ;;  %2089 = vmax.xlane.f32.xlu0 %v2088_v60  ;;  %2098 = vmax.xlane.f32.xlu1 %v2097_v22  ;;  %v2078_v24 = vpop.f32.mrb[10].mxu0 }
 0x418   : > { %v1851_v25 = vadd.f32 %v1850_v23, %v1472_v62  ;;  %v2079_v26 = vadd.f32 %v2078_v24, %v1472_v62  ;;  %v3622_v27 = vpop.f32.mrb[5].mxu1  ;;  %v3637_v28 = vpop.f32.mrb[11].mxu0 }
 0x41a   : > { %v2094_v29 = vsel %vm1473_vm2, %v1851_v25, -inf  ;;  %v2103_v30 = vsel %vm1473_vm2, %v2079_v26, -inf }
 0x41b   : > { %v2002_v31 = vpop.f32.mrb[6].mxu1  ;;  %2095 = vmax.xlane.f32.xlu0 %v2094_v29  ;;  %2104 = vmax.xlane.f32.xlu1 %v2103_v30 }
 0x41c   : > { %v2003_v32 = vadd.f32 %v2002_v31, %v1472_v62  ;;  %v3632_v15 = vpop.f32.mrb[7].mxu1 }
 0x41e   : > { %v2100_v17 = vsel %vm1473_vm2, %v2003_v32, -inf }
 0x41f   : > { %2101 = vmax.xlane.f32.xlu0 %v2100_v17 }
 0x42c   : > { %1178 = vrot.lane.b32.xlu1 %v4086_v41, %s4584_s25 }
 0x430   : > { %1180 = vrot.lane.b32.xlu1 %v4096_v43, %s4584_s25 }
 0x434   : > { %1182 = vrot.lane.b32.xlu1 %v4099_v44, %s4584_s25 }
 0x435   : > { %1176 = vrot.lane.b32.xlu0 %v4082_v37, %s4584_s25 }
 0x438   : > { %1186 = vrot.lane.b32.xlu1 %v4105_v46, %s4584_s25 }
 0x439   : > { %1184 = vrot.lane.b32.xlu0 %v4094_v42, %s4584_s25 }
 0x43c   : > { %1190 = vrot.lane.b32.xlu1 %v4109_v47, %s4584_s25 }
 0x43d   : > { %1188 = vrot.lane.b32.xlu0 %v4103_v45, %s4584_s25  ;;  %s3535_s25 = sshll.u32 %s4013_s17, 7 }
 0x43e   : > { %s4522_s18 = scalar_lea.hbm %s4583_s14, %s3535_s25 }
 0x49b   : > { %v2084_v41 = vpop.xlane.xlu0 %2083 }
 0x49c   : > { %v2106_v43 = vsub.f32 %v1547_v0, %v2084_v41 }
 0x49e   : > { %v2114_v33 = vmul.f32 1.442695, %v2106_v43 }
 0x4a0   : > { %3799 = vpow2.f32 %v2114_v33  ;;  %v2087_v44 = vpop.xlane.xlu1 %2086  ;;  %v2093_v39 = vpop.xlane.xlu0 %2092 }
 0x4a1   : > { %v2107_v40 = vsub.f32 %v1623_v10, %v2087_v44  ;;  %v2109_v37 = vsub.f32 %v1775_v11, %v2093_v39 }
 0x4a3   : > { %v2116_v48 = vmul.f32 1.442695, %v2107_v40  ;;  %v2120_v49 = vmul.f32 1.442695, %v2109_v37 }
 0x4a4   : > { %v2090_v46 = vpop.xlane.xlu0 %2089  ;;  %v2099_v50 = vpop.xlane.xlu1 %2098 }
 0x4a5   : > { %3801 = vpow2.f32 %v2116_v48  ;;  %v2108_v42 = vsub.f32 %v1699_v19, %v2090_v46  ;;  %v2111_v51 = vsub.f32 %v1927_v20, %v2099_v50 }
 0x4a6   : > { %3803 = vpow2.f32 %v2120_v49 }
 0x4a7   : > { %v2118_v47 = vmul.f32 1.442695, %v2108_v42  ;;  %v2124_v52 = vmul.f32 1.442695, %v2111_v51 }
 0x4a8   : > { %v2096_v34 = vpop.xlane.xlu0 %2095  ;;  %v2105_v45 = vpop.xlane.xlu1 %2104 }
 0x4a9   : > { %3805 = vpow2.f32 %v2118_v47  ;;  %v2110_v35 = vsub.f32 %v1851_v25, %v2096_v34  ;;  %v2113_v36 = vsub.f32 %v2079_v26, %v2105_v45 }
 0x4aa   : > { %v4287_v38 = vpop.eup %3799  ;;  %3807 = vpow2.f32 %v2124_v52 }
 0x4ab   : > { %v2122_v53 = vmul.f32 1.442695, %v2110_v35  ;;  %v2130_v54 = vsel %vm1473_vm2, %v4287_v38, 0.0  ;;  %v2128_v55 = vmul.f32 1.442695, %v2113_v36 }
 0x4ac   : > { %v2102_v56 = vpop.xlane.xlu0 %2101  ;;  %v1179_v58 = vpop.permute.xlu1 %1178  ;;  %2131 = vadd.xlane.f32.xlu0 %v2130_v54 }
 0x4ad   : > { %3809 = vpow2.f32 %v2122_v53  ;;  %v2112_v61 = vsub.f32 %v2003_v32, %v2102_v56 }
 0x4ae   : > { %3811 = vpow2.f32 %v2128_v55 }
 0x4af   : > { %v4291_v62 = vpop.eup %3801  ;;  %v2126_v63 = vmul.f32 1.442695, %v2112_v61 }
 0x4b0   : > { %v1177_v0 = vpop.permute.xlu0 %1176  ;;  %v1181_v6 = vpop.permute.xlu1 %1180  ;;  %v2133_v7 = vsel %vm1473_vm2, %v4291_v62, 0.0 }
 0x4b1   : > { %v4295_v8 = vpop.eup %3803  ;;  %3813 = vpow2.f32 %v2126_v63  ;;  %2134 = vadd.xlane.f32.xlu1 %v2133_v7 }
 0x4b2   : > { %v2139_v5 = vsel %vm1473_vm2, %v4295_v8, 0.0 }
 0x4b3   : > { %v4297_v9 = vpop.eup %3805 }
 0x4b4   : > { %v1185_v10 = vpop.permute.xlu0 %1184  ;;  %v1183_v11 = vpop.permute.xlu1 %1182  ;;  %v2136_v4 = vsel %vm1473_vm2, %v4297_v9, 0.0 }
 0x4b5   : > { %2137 = vadd.xlane.f32.xlu0 %v2136_v4  ;;  %2140 = vadd.xlane.f32.xlu1 %v2139_v5  ;;  %v4303_v12 = vpop.eup %3807  ;;  %v1200_v14 = vcombine.low %v1177_v0, %v1185_v10  ;;  %v1201_v18 = vcombine.high %v1177_v0, %v1185_v10 }
 0x4b6   : > { %v2145_v22 = vsel %vm1473_vm2, %v4303_v12, 0.0 }
 0x4b7   : > { %v4305_v13 = vpop.eup %3809  ;;  %v1208_v25 = vrot.slane %v1200_v14, %v4116_v57  ;;  %v1215_v26 = vrot.slane %v1201_v18, %v4116_v57 }
 0x4b8   : > { %v1189_v19 = vpop.permute.xlu0 %1188  ;;  %v1187_v20 = vpop.permute.xlu1 %1186  ;;  %v2142_v21 = vsel %vm1473_vm2, %v4305_v13, 0.0 }
 0x4b9   : > { %v1216_v59 = vcombine.low %v1181_v6, %v1189_v19  ;;  %v1217_v60 = vcombine.high %v1181_v6, %v1189_v19  ;;  %2143 = vadd.xlane.f32.xlu0 %v2142_v21  ;;  %v4311_v23 = vpop.eup %3811  ;;  %2146 = vadd.xlane.f32.xlu1 %v2145_v22  ;;  %v1268_v29 = vcombine.low %v1179_v58, %v1187_v20 }
 0x4ba   : > { %v1269_v30 = vcombine.high %v1179_v58, %v1187_v20  ;;  %v2151_v39 = vsel %vm1473_vm2, %v4311_v23, 0.0 }
 0x4bb   : > { %v4313_v24 = vpop.eup %3813  ;;  %v1224_v27 = vrot.slane %v1216_v59, %v4116_v57  ;;  %v1231_v28 = vrot.slane %v1217_v60, %v4116_v57  ;;  %v1276_v46 = vrot.slane %v1268_v29, %v4116_v57 }
 0x4bc   : > { %v1191_v31 = vpop.permute.xlu1 %1190  ;;  %v2148_v32 = vsel %vm1473_vm2, %v4313_v24, 0.0  ;;  %v1283_v50 = vrot.slane %v1269_v30, %v4116_v57 }
 0x4bd   : > { %v1232_v15 = vcombine.low %v1208_v25, %v1224_v27  ;;  %v1233_v17 = vcombine.high %v1208_v25, %v1224_v27  ;;  %v1248_v41 = vcombine.low %v1215_v26, %v1231_v28  ;;  %v1249_v43 = vcombine.high %v1215_v26, %v1231_v28  ;;  %2149 = vadd.xlane.f32.xlu0 %v2148_v32 }
 0x4be   : > { %v1284_v33 = vcombine.low %v1183_v11, %v1191_v31  ;;  %v1285_v44 = vcombine.high %v1183_v11, %v1191_v31 }
 0x4bf   : > { %v1240_v40 = vrot.slane %v1232_v15, %v4126_v3  ;;  %v1247_v37 = vrot.slane %v1233_v17, %v4126_v3  ;;  %v1256_v48 = vrot.slane %v1248_v41, %v4126_v3  ;;  %v1263_v49 = vrot.slane %v1249_v43, %v4126_v3 }
 0x4c0   : > { %v1292_v42 = vrot.slane %v1284_v33, %v4116_v57  ;;  %v1299_v51 = vrot.slane %v1285_v44, %v4116_v57 }
 0x4c1   : > { %v1336_v47 = vcombine.low %v1240_v40, %v1247_v37  ;;  %v3479_v52 = vcombine.high %v1240_v40, %v1247_v37  ;;  %v1352_v34 = vcombine.low %v1256_v48, %v1263_v49  ;;  %v3480_v45 = vcombine.high %v1256_v48, %v1263_v49  ;;  %2152 = vadd.xlane.f32.xlu0 %v2151_v39 }
 0x4c2   : > { %v1300_v35 = vcombine.low %v1276_v46, %v1292_v42  ;;  %v1301_v36 = vcombine.high %v1276_v46, %v1292_v42  ;;  %v1316_v53 = vcombine.low %v1283_v50, %v1299_v51  ;;  %v1317_v54 = vcombine.high %v1283_v50, %v1299_v51 }
 0x4c3   : > { %v1343_v55 = vrot.slane %v1336_v47, %v4116_v57  ;;  %v1351_v56 = vrot.slane %v3479_v52, %v4116_v57  ;;  %v1359_v58 = vrot.slane %v1352_v34, %v4116_v57  ;;  %v1367_v61 = vrot.slane %v3480_v45, %v4116_v57 }
 0x4c4   : > { %v1308_v63 = vrot.slane %v1300_v35, %v4126_v3  ;;  %v1315_v0 = vrot.slane %v1301_v36, %v4126_v3  ;;  %v1324_v6 = vrot.slane %v1316_v53, %v4126_v3  ;;  %v1331_v7 = vrot.slane %v1317_v54, %v4126_v3 }
 0x4c5   : > { %v1368_v10 = vcombine.low %v1343_v55, %v1351_v56  ;;  %v1384_v11 = vcombine.low %v1359_v58, %v1367_v61  ;;  %v1369_v4 = vcombine.high %v1343_v55, %v1351_v56  ;;  %v1385_v5 = vcombine.high %v1359_v58, %v1367_v61 }
 0x4c6   : > { %v1404_v14 = vcombine.low %v1308_v63, %v1315_v0  ;;  %v3481_v18 = vcombine.high %v1308_v63, %v1315_v0  ;;  %v1420_v19 = vcombine.low %v1324_v6, %v1331_v7  ;;  %v3482_v20 = vcombine.high %v1324_v6, %v1331_v7 }
 0x4c7   : > { %v1376_v21 = vrot.slane %v1368_v10, %v4126_v3  ;;  %v1392_v59 = vrot.slane %v1384_v11, %v4126_v3  ;;  %v4342_v60 = vrot.slane %v1369_v4, %v4126_v3  ;;  %v4345_v22 = vrot.slane %v1385_v5, %v4126_v3 }
 0x4c8   : > { %v1411_v25 = vrot.slane %v1404_v14, %v4116_v57  ;;  %v1419_v26 = vrot.slane %v3481_v18, %v4116_v57  ;;  %v1427_v27 = vrot.slane %v1420_v19, %v4116_v57  ;;  %v1435_v28 = vrot.slane %v3482_v20, %v4116_v57 }
 0x4c9   : > { %v1400_v29 = vcombine.low %v1376_v21, %v1392_v59  ;;  %v1401_v30 = vcombine.high %v1376_v21, %v1392_v59  ;;  %v1402_v31 = vcombine.low %v4342_v60, %v4345_v22  ;;  %v1403_v32 = vcombine.high %v4342_v60, %v4345_v22 }
 0x4ca   : > { %v1436_v15 = vcombine.low %v1411_v25, %v1419_v26  ;;  %v1452_v17 = vcombine.low %v1427_v27, %v1435_v28  ;;  %v1437_v41 = vcombine.high %v1411_v25, %v1419_v26  ;;  %v1453_v43 = vcombine.high %v1427_v27, %v1435_v28 }
 0x4cb   : > { %3639 = vmatpush3.msra.mxu1 %v1400_v29 }
 0x4cc   : > { %v1444_v33 = vrot.slane %v1436_v15, %v4126_v3  ;;  %v1460_v44 = vrot.slane %v1452_v17, %v4126_v3  ;;  %3648 = vmatprep.subr.mxu1 %v3903_v16  ;;  %v1451_v39 = vrot.slane %v1437_v41, %v4126_v3  ;;  %v1467_v40 = vrot.slane %v1453_v43, %v4126_v3 }
 0x4ce   : > { %v1468_v37 = vcombine.low %v1444_v33, %v1460_v44  ;;  %v1469_v48 = vcombine.high %v1444_v33, %v1460_v44  ;;  %v1470_v49 = vcombine.low %v1451_v39, %v1467_v40  ;;  %v1471_v46 = vcombine.high %v1451_v39, %v1467_v40 }
 0x4d0   : > { %3644 = vmatpush3.msra.mxu0 %v1468_v37 }
 0x4d1   : > { %3653 = vmatprep.subr.mxu0 %v3903_v16 }
 0x539   : > { %v2132_v50 = vpop.xlane.xlu0 %2131 }
 0x53a   : > { %3815 = vrcp.f32 %v2132_v50 }
 0x53e   : > { %v2135_v42 = vpop.xlane.xlu1 %2134 }
 0x53f   : > { %3817 = vrcp.f32 %v2135_v42 }
 0x542   : > { %v2138_v51 = vpop.xlane.xlu0 %2137  ;;  %v2141_v47 = vpop.xlane.xlu1 %2140 }
 0x543   : > { %3819 = vrcp.f32 %v2138_v51 }
 0x544   : > { %v3816_v52 = vpop.eup %3815  ;;  %3821 = vrcp.f32 %v2141_v47 }
 0x545   : > { %v2162_v34 = vmul.f32 %v3816_v52, %v4287_v38 }
 0x546   : > { %v2144_v45 = vpop.xlane.xlu0 %2143  ;;  %v2147_v35 = vpop.xlane.xlu1 %2146 }
 0x547   : > { %3823 = vrcp.f32 %v2144_v45  ;;  %3641 = vmatmul.mubr.msk.f32.vlgmr.msra.gmra.mrb[8].mxu1 %vm1473_vm2, %v2162_v34 }
 0x548   : > { %3825 = vrcp.f32 %v2147_v35  ;;  %3649 = vmatpush3.msra.mxu1 %v1401_v30  ;;  %3650 = vmatprep.mubr.msk.f32.mxu1 %vm3904_vm1, %v3903_v16 }
 0x549   : > { %v3818_v36 = vpop.eup %3817  ;;  %3658 = vmatprep.subr.mxu1 %v3903_v16 }
 0x54a   : > { %v2163_v53 = vmul.f32 %v3818_v36, %v4291_v62  ;;  %v2150_v54 = vpop.xlane.xlu0 %2149 }
 0x54b   : > { %3827 = vrcp.f32 %v2150_v54 }
 0x54c   : > { %3646 = vmatmul.mubr.msk.f32.vlgmr.msra.gmra.mrb[12].mxu0 %vm1473_vm2, %v2163_v53 }
 0x54d   : > { %v3820_v38 = vpop.eup %3819  ;;  %3654 = vmatpush3.msra.mxu0 %v1469_v48  ;;  %3655 = vmatprep.mubr.msk.f32.mxu0 %vm3904_vm1, %v3903_v16 }
 0x54e   : > { %v3822_v55 = vpop.eup %3821  ;;  %v2164_v56 = vmul.f32 %v3820_v38, %v4297_v9  ;;  %v2153_v58 = vpop.xlane.xlu0 %2152  ;;  %3663 = vmatprep.subr.mxu0 %v3903_v16 }
 0x54f   : > { %v2165_v61 = vmul.f32 %v3822_v55, %v4295_v8  ;;  %3829 = vrcp.f32 %v2153_v58 }
 0x550   : > { %3651 = vmatmul.mubr.msk.f32.vlgmr.msra.gmra.mrb[10].mxu1 %vm1473_vm2, %v2164_v56 }
 0x551   : > { %v3824_v62 = vpop.eup %3823  ;;  %3656 = vmatmul.mubr.msk.f32.vlgmr.msra.gmra.mrb[14].mxu0 %vm1473_vm2, %v2165_v61  ;;  %3659 = vmatpush3.msra.mxu1 %v1402_v31 }
 0x552   : > { %v3826_v63 = vpop.eup %3825  ;;  %v2166_v0 = vmul.f32 %v3824_v62, %v4305_v13  ;;  %3664 = vmatpush3.msra.mxu0 %v1470_v49  ;;  %3660 = vmatprep.mubr.msk.f32.mxu1 %vm3904_vm1, %v3903_v16 }
 0x553   : > { %v2167_v9 = vmul.f32 %v3826_v63, %v4303_v12  ;;  %3665 = vmatprep.mubr.msk.f32.mxu0 %vm3904_vm1, %v3903_v16  ;;  %3668 = vmatprep.subr.mxu1 %v3903_v16 }
 0x554   : > { %3673 = vmatprep.subr.mxu0 %v3903_v16  ;;  %3661 = vmatmul.mubr.msk.f32.vlgmr.msra.gmra.mrb[12].mxu1 %vm1473_vm2, %v2166_v0 }
 0x555   : > { %v3828_v8 = vpop.eup %3827  ;;  %3666 = vmatmul.mubr.msk.f32.vlgmr.msra.gmra.mrb[16].mxu0 %vm1473_vm2, %v2167_v9  ;;  %3669 = vmatpush3.msra.mxu1 %v1403_v32 }
 0x556   : > { %v2168_v13 = vmul.f32 %v3828_v8, %v4313_v24  ;;  %3674 = vmatpush3.msra.mxu0 %v1471_v46  ;;  %3670 = vmatprep.mubr.msk.f32.mxu1 %vm3904_vm1, %v3903_v16 }
 0x557   : > { %3675 = vmatprep.mubr.msk.f32.mxu0 %vm3904_vm1, %v3903_v16  ;;  %3678 = vmatprep.subr.bf16.mxu0 %v3903_v16 }
 0x558   : > { %3671 = vmatmul.mubr.msk.f32.vlgmr.msra.gmra.mrb[14].mxu1 %vm1473_vm2, %v2168_v13  ;;  %3694 = vmatprep.subr.bf16.mxu1 %v3903_v16 }
 0x559   : > { %v3830_v12 = vpop.eup %3829  ;;  %3710 = vmatprep.mubr.msk.bf16.mxu1 %vm3904_vm1, %v3903_v16 }
 0x55a   : > { %v2169_v6 = vmul.f32 %v3830_v12, %v4311_v23 }
 0x55c   : > { %3676 = vmatmul.mubr.msk.f32.vlgmr.msra.gmra.mrb[18].mxu0 %vm1473_vm2, %v2169_v6 }
 0x55d   : > { %3682 = vmatprep.mubr.msk.bf16.mxu0 %vm3904_vm1, %v3903_v16 }
 0x61a   : > { %v2239_v24 = vpop.f32.mrb[8].mxu1 }
 0x61b   : > { %v3642_v7 = vpop.f32.mrb[9].mxu1 }
 0x61f   : > { %v2312_v10 = vpop.f32.mrb[12].mxu0 }
 0x620   : > { %v3647_v11 = vpop.f32.mrb[13].mxu0 }
 0x623   : > { %v2385_v4 = vpop.f32.mrb[10].mxu1 }
 0x624   : > { %v2458_v5 = vpop.f32.mrb[14].mxu0  ;;  %v3652_v14 = vpop.f32.mrb[11].mxu1 }
 0x625   : > { %v3657_v18 = vpop.f32.mrb[15].mxu0 }
 0x627   : > { %v2531_v19 = vpop.f32.mrb[12].mxu1 }
 0x628   : > { %v2754_v20 = vcombine.low %v2239_v24, %v2531_v19  ;;  %v2755_v21 = vcombine.high %v2239_v24, %v2531_v19  ;;  %v2604_v59 = vpop.f32.mrb[16].mxu0  ;;  %v3662_v60 = vpop.f32.mrb[13].mxu1 }
 0x629   : > { %v2822_v22 = vcombine.low %v2312_v10, %v2604_v59  ;;  %v2823_v23 = vcombine.high %v2312_v10, %v2604_v59  ;;  %v3667_v25 = vpop.f32.mrb[17].mxu0 }
 0x62a   : > { %v2762_v30 = vrot.slane %v2754_v20, %v4116_v57  ;;  %v2769_v31 = vrot.slane %v2755_v21, %v4116_v57 }
 0x62b   : > { %v2677_v26 = vpop.f32.mrb[14].mxu1  ;;  %v2830_v42 = vrot.slane %v2822_v22, %v4116_v57  ;;  %v2837_v51 = vrot.slane %v2823_v23, %v4116_v57 }
 0x62c   : > { %v2770_v27 = vcombine.low %v2385_v4, %v2677_v26  ;;  %v2771_v28 = vcombine.high %v2385_v4, %v2677_v26  ;;  %v3672_v29 = vpop.f32.mrb[15].mxu1 }
 0x62e   : > { %v2778_v32 = vrot.slane %v2770_v27, %v4116_v57  ;;  %v2785_v15 = vrot.slane %v2771_v28, %v4116_v57 }
 0x62f   : > { %v2750_v17 = vpop.f32.mrb[18].mxu0 }
 0x630   : > { %v2786_v41 = vcombine.low %v2762_v30, %v2778_v32  ;;  %v2787_v43 = vcombine.high %v2762_v30, %v2778_v32  ;;  %v2802_v33 = vcombine.low %v2769_v31, %v2785_v15  ;;  %v2803_v44 = vcombine.high %v2769_v31, %v2785_v15  ;;  %v3677_v39 = vpop.f32.mrb[19].mxu0  ;;  %v3784_v32 = vld [vmem:[%s4575_s6 + $0x8] sm:$0xff]  }
 0x631   : > { %v2838_v40 = vcombine.low %v2458_v5, %v2750_v17  ;;  %v2839_v37 = vcombine.high %v2458_v5, %v2750_v17  ;;  %v3783_v5 = vld [vmem:[%s4575_s6] sm:$0xff]  }
 0x632   : > { %v2794_v48 = vrot.slane %v2786_v41, %v4126_v3  ;;  %v2801_v49 = vrot.slane %v2787_v43, %v4126_v3  ;;  %v2810_v46 = vrot.slane %v2802_v33, %v4126_v3  ;;  %v2817_v50 = vrot.slane %v2803_v44, %v4126_v3  ;;  %3679 = vmatpush3.bf16.msra.mxu0 %v3783_v5 }
 0x633   : > { %v2846_v47 = vrot.slane %v2838_v40, %v4116_v57  ;;  %v2853_v52 = vrot.slane %v2839_v37, %v4116_v57  ;;  %3680 = vmatprep.subr.bf16.mxu0 %v3903_v16 }
 0x634   : > { %v2890_v34 = vcombine.low %v2794_v48, %v2801_v49  ;;  %v3507_v45 = vcombine.high %v2794_v48, %v2801_v49  ;;  %v2906_v35 = vcombine.low %v2810_v46, %v2817_v50  ;;  %v3508_v36 = vcombine.high %v2810_v46, %v2817_v50 }
 0x635   : > { %v2854_v53 = vcombine.low %v2830_v42, %v2846_v47  ;;  %v2855_v54 = vcombine.high %v2830_v42, %v2846_v47  ;;  %v2870_v38 = vcombine.low %v2837_v51, %v2853_v52  ;;  %v2871_v55 = vcombine.high %v2837_v51, %v2853_v52 }
 0x636   : > { %v2897_v56 = vrot.slane %v2890_v34, %v4116_v57  ;;  %v2905_v58 = vrot.slane %v3507_v45, %v4116_v57  ;;  %v2913_v61 = vrot.slane %v2906_v35, %v4116_v57  ;;  %v2921_v62 = vrot.slane %v3508_v36, %v4116_v57  ;;  %3681 = vmatpush3.bf16.msra.mxu0 %v3784_v32  ;;  %v3516_v32 = vld [vmem:[%s4578_s9] ss:$0 sm:$0xff] }
 0x637   : > { %v2862_v63 = vrot.slane %v2854_v53, %v4126_v3  ;;  %v2869_v0 = vrot.slane %v2855_v54, %v4126_v3  ;;  %v2878_v9 = vrot.slane %v2870_v38, %v4126_v3  ;;  %v2885_v8 = vrot.slane %v2871_v55, %v4126_v3  ;;  %3686 = vmatprep.subr.bf16.mxu0 %v3903_v16 }
 0x638   : > { %v2923_v13 = vcombine.high %v2897_v56, %v2905_v58  ;;  %v2939_v12 = vcombine.high %v2913_v61, %v2921_v62  ;;  %v2922_v6 = vcombine.low %v2897_v56, %v2905_v58  ;;  %v2938_v24 = vcombine.low %v2913_v61, %v2921_v62  ;;  %v3514_v58 = vld [vmem:[%s4576_s7] ss:$0 sm:$0xff] }
 0x639   : > { %v2958_v7 = vcombine.low %v2862_v63, %v2869_v0  ;;  %v3509_v10 = vcombine.high %v2862_v63, %v2869_v0  ;;  %v2974_v11 = vcombine.low %v2878_v9, %v2885_v8  ;;  %v3510_v4 = vcombine.high %v2878_v9, %v2885_v8 }
 0x63a   : > { %v2937_v14 = vrot.slane %v2923_v13, %v4126_v3  ;;  %v2953_v18 = vrot.slane %v2939_v12, %v4126_v3  ;;  %v2930_v19 = vrot.slane %v2922_v6, %v4126_v3  ;;  %v2946_v20 = vrot.slane %v2938_v24, %v4126_v3 }
 0x63b   : > { %v2965_v21 = vrot.slane %v2958_v7, %v4116_v57  ;;  %v2973_v59 = vrot.slane %v3509_v10, %v4116_v57  ;;  %v2981_v60 = vrot.slane %v2974_v11, %v4116_v57  ;;  %v2989_v22 = vrot.slane %v3510_v4, %v4116_v57 }
 0x63c   : > { %v2956_v23 = vcombine.low %v2937_v14, %v2953_v18  ;;  %v2954_v25 = vcombine.low %v2930_v19, %v2946_v20  ;;  %v2955_v26 = vcombine.high %v2930_v19, %v2946_v20  ;;  %v2957_v27 = vcombine.high %v2937_v14, %v2953_v18  ;;  %v3785_v19 = vld [vmem:[%s4579_s10] sm:$0xff]   ;;  %v3786_v20 = vld [vmem:[%s4579_s10 + $0x8] sm:$0xff]  }
 0x63d   : > { %v2991_v28 = vcombine.high %v2965_v21, %v2973_v59  ;;  %v3007_v29 = vcombine.high %v2981_v60, %v2989_v22  ;;  %v2990_v30 = vcombine.low %v2965_v21, %v2973_v59  ;;  %v3006_v31 = vcombine.low %v2981_v60, %v2989_v22 }
 0x63f   : > { %v3005_v15 = vrot.slane %v2991_v28, %v4126_v3  ;;  %v3021_v17 = vrot.slane %v3007_v29, %v4126_v3  ;;  %v2998_v57 = vrot.slane %v2990_v30, %v4126_v3  ;;  %v3014_v41 = vrot.slane %v3006_v31, %v4126_v3  ;;  %v3515_v28 = vld [vmem:[%s4577_s8] ss:$0 sm:$0xff] }
 0x641   : > { %v3024_v43 = vcombine.low %v3005_v15, %v3021_v17  ;;  %v3023_v33 = vcombine.high %v2998_v57, %v3014_v41  ;;  %v3022_v44 = vcombine.low %v2998_v57, %v3014_v41  ;;  %v3025_v39 = vcombine.high %v3005_v15, %v3021_v17 }
 0x643   : > { %v3771_v40 = vpack.i.bf16 %v3024_v43, %v2956_v23  ;;  %v3766_v37 = vpack.i.bf16 %v3023_v33, %v2955_v26  ;;  %v3776_v48 = vpack.i.bf16 %v3025_v39, %v2957_v27  ;;  %v3787_v43 = vld [vmem:[%s4581_s12] sm:$0xff]   ;;  %v3788_v33 = vld [vmem:[%s4581_s12 + $0x8] sm:$0xff]   ;;  %v3790_v39 = vld [vmem:[%s4581_s12 + $0x18] sm:$0xff]  }
 0x644   : > { %3695 = vmatpush3.bf16.msra.mxu1 %v3787_v43 }
 0x645   : > { %3772 = vrot.lane.b32.xlu1 %v3771_v40, %s3912_s20  ;;  %3767 = vrot.lane.b32.xlu0 %v3766_v37, %s3913_s21  ;;  %v3791_v40 = vld [vmem:[%s4581_s12 + $0x20] sm:$0xff]   ;;  %v3792_v37 = vld [vmem:[%s4581_s12 + $0x28] sm:$0xff]   ;;  %s461_s21 = scalar_lea.vmem [#allocation2], %s3462_s28  ;;  %s4526_s20 = scalar_lea.sflag [#allocation3], %s459_s0 }
 0x646   : > { %3696 = vmatprep.subr.bf16.mxu1 %v3903_v16  ;;  %s3915_s28 = smov [#allocation2]  }
 0x647   : > { %s3843_s2 = sshll.u32 %s3915_s28, 4  ;;  %s3844_s2 = int_to_ptr.vmem [resolvable:$false] %s3843_s2 }
 0x648   : > { %3697 = vmatpush3.bf16.msra.mxu1 %v3788_v33  ;;  %s3845_s1 = scalar_lea.vmem %s3844_s2, 256 }
 0x649   : > { %3777 = vrot.lane.b32.xlu1 %v3776_v48, %s3914_s26  ;;  %3698 = vmatprep.subr.bf16.mxu1 %v3903_v16  ;;  %v3793_v48 = vld [vmem:[%s4581_s12 + $0x30] sm:$0xff]   ;;  %s3396_s26 = sshll.u32 %s461_s21, 4  ;;  %s4524_s26 = int_to_ptr.vmem [resolvable:$true] %s3396_s26 }
 0x64a   : > { %s3839_s17 = scalar_lea.vmem %s4524_s26, 128  ;;  %p3846_p0 = scmp.lt.s32.totalorder %s4524_s26, %s3844_s2 }
 0x64b   : > { %p3840_p11 = scmp.ne.s32.totalorder %s4524_s26, %s3839_s17  ;;  %p3847_p1 = scmp.lt.s32.totalorder %s3845_s1, %s3839_s17 }
 0x64d   : > { %p3841_p12 = pnand %p3840_p11, %p4030_p5  ;;  %p3848_p2 = por %p3847_p1, %p3846_p0 }
 0x64f   : > { %p3842_p13 = pneg %p3841_p12 }
 0x651   : > { %p3849_p3 = pnand %p3848_p2, %p3842_p13 }
 0x6b7   : > { %v3773_v49 = vpop.permute.xlu1 %3772  ;;  %v3768_v46 = vpop.permute.xlu0 %3767 }
 0x6b8   : > { %v3770_v50 = vunpack.i.h.bf16 %v3768_v46  ;;  %v3769_v3 = vunpack.i.l.bf16 %v3768_v46  ;;  %v3775_v42 = vunpack.i.h.bf16 %v3773_v49  ;;  %v3774_v51 = vunpack.i.l.bf16 %v3773_v49  ;;  %v3794_v49 = vld [vmem:[%s4581_s12 + $0x38] sm:$0xff]   ;;  %v3517_v46 = vld [vmem:[%s4580_s11] ss:$0 sm:$0xff] }
 0x6ba   : > { %v3050_v47 = vsel %vm1473_vm2, %v2954_v25, %v3769_v3  ;;  %v3051_v52 = vsel %vm1473_vm2, %v3022_v44, %v3770_v50  ;;  %v3789_v44 = vld [vmem:[%s4581_s12 + $0x10] sm:$0xff]  }
 0x6bb   : > { %v3778_v34 = vpop.permute.xlu1 %3777  ;;  %v3053_v36 = vsel %vm3052_vm3, %v3050_v47, %v3774_v51  ;;  %v3054_v53 = vsel %vm3052_vm3, %v3051_v52, %v3775_v42  ;;  %3699 = vmatpush3.bf16.msra.mxu1 %v3789_v44 }
 0x6bc   : > { %v3780_v45 = vunpack.i.h.bf16 %v3778_v34  ;;  %v3779_v35 = vunpack.i.l.bf16 %v3778_v34  ;;  %3700 = vmatprep.subr.bf16.mxu1 %v3903_v16 }
 0x6be   : > { %v3056_v54 = vsel %vm3055_vm4, %v3053_v36, %v3779_v35  ;;  %v3057_v38 = vsel %vm3055_vm4, %v3054_v53, %v3780_v45 }
 0x6bf   : > { %v3062_v55 = vpack.c.bf16 %v3057_v38, %v3056_v54  ;;  %3701 = vmatpush3.bf16.msra.mxu1 %v3790_v39 }
 0x6c0   : > { %3702 = vmatprep.subr.bf16.mxu1 %v3903_v16 }
 0x6c1   : > { %3683 = vmatmul.mubr.msk.bf16.vlgmr.msra.gmra.mrb[20].mxu0 %vm476_vm0, %v3062_v55 }
 0x6c2   : > { %3690 = vmatprep.mubr.msk.bf16.mxu0 %vm3904_vm1, %v3903_v16  ;;  %3687 = vmatpush3.bf16.msra.mxu0 %v3785_v19 }
 0x6c3   : > { %3688 = vmatprep.subr.bf16.mxu0 %v3903_v16  ;;  %3703 = vmatpush3.bf16.msra.mxu1 %v3791_v40 }
 0x6c4   : > { %3704 = vmatprep.subr.bf16.mxu1 %v3903_v16 }
 0x6c6   : > { %3689 = vmatpush3.bf16.msra.mxu0 %v3786_v20 }
 0x6c7   : > { %3705 = vmatpush3.bf16.msra.mxu1 %v3792_v37 }
 0x6c8   : > { %3706 = vmatprep.subr.bf16.mxu1 %v3903_v16 }
 0x6cb   : > { %3707 = vmatpush3.bf16.msra.mxu1 %v3793_v48 }
 0x6cc   : > { %3708 = vmatprep.subr.bf16.mxu1 %v3903_v16 }
 0x6cf   : > { %3709 = vmatpush3.bf16.msra.mxu1 %v3794_v49 }
 0x794   : > { %v3112_v56 = vpop.f32.mrb[20].mxu0 }
 0x795   : > { %v3119_v61 = vadd.f32 %v4044_v1, %v3112_v56  ;;  %v3684_v62 = vpop.f32.mrb[21].mxu0 }
 0x796   : > { %v3115_v63 = vpop.f32.mrb[22].mxu0 }
 0x797   : > { %v4451_v0 = vadd.f32 %v3514_v58, %v3119_v61  ;;  %v3120_v9 = vadd.f32 %v4046_v2, %v3115_v63  ;;  %v3685_v8 = vpop.f32.mrb[23].mxu0 }
 0x799   : > { %v4454_v13 = vadd.f32 %v3514_v58, %v3120_v9  ;;  %v3132_v12 = vsel %vm476_vm0, %v4451_v0, 0.0 }
 0x79a   : > { %3133 = vadd.xlane.f32.xlu1 %v3132_v12 }
 0x79b   : > { %v3135_v6 = vsel %vm476_vm0, %v4454_v13, 0.0 }
 0x79c   : > { %3136 = vadd.xlane.f32.xlu0 %v3135_v6 }
 0x827   : > { %v3134_v24 = vpop.xlane.xlu1 %3133 }
 0x828   : > { %v3138_v7 = vmul.f32 0.03125, %v3134_v24 }
 0x829   : > { %v3137_v1 = vpop.xlane.xlu0 %3136 }
 0x82a   : > { %v3140_v10 = vsub.f32 %v4451_v0, %v3138_v7  ;;  %v3139_v11 = vmul.f32 0.03125, %v3137_v1  ;;  %v3529_v1 = vld [vmem:[%s4582_s13] ss:$0 sm:$0xff] }
 0x82c   : > { %v3141_v4 = vsub.f32 %v4454_v13, %v3139_v11  ;;  %v3142_v2 = vmul.f32 %v3140_v10, %v3140_v10 }
 0x82e   : > { %v3144_v5 = vsel %vm476_vm0, %v3142_v2, 0.0  ;;  %v3143_v14 = vmul.f32 %v3141_v4, %v3141_v4 }
 0x82f   : > { %3145 = vadd.xlane.f32.xlu0 %v3144_v5 }
 0x830   : > { %v3147_v18 = vsel %vm476_vm0, %v3143_v14, 0.0 }
 0x833   : > { %3148 = vadd.xlane.f32.xlu0 %v3147_v18 }
 0x8bc   : > { %v3146_v21 = vpop.xlane.xlu0 %3145 }
 0x8bd   : > { %v3150_v59 = vmul.f32 0.03125, %v3146_v21 }
 0x8bf   : > { %v3152_v60 = vadd.f32 1e-05, %v3150_v59 }
 0x8c0   : > { %v3149_v22 = vpop.xlane.xlu0 %3148 }
 0x8c1   : > { %3831 = vrsqrt.f32 %v3152_v60  ;;  %v3151_v23 = vmul.f32 0.03125, %v3149_v22 }
 0x8c3   : > { %v3153_v25 = vadd.f32 1e-05, %v3151_v23 }
 0x8c5   : > { %3833 = vrsqrt.f32 %v3153_v25 }
 0x8cb   : > { %v3832_v26 = vpop.eup %3831 }
 0x8cc   : > { %v3156_v27 = vmul.f32 %v3832_v26, %v3140_v10 }
 0x8ce   : > { %v3164_v30 = vmul.f32 %v3515_v28, %v3156_v27 }
 0x8cf   : > { %v3834_v29 = vpop.eup %3833 }
 0x8d0   : > { %v3157_v31 = vmul.f32 %v3834_v29, %v3141_v4  ;;  %v3172_v17 = vadd.f32 %v3516_v32, %v3164_v30 }
 0x8d2   : > { %v3165_v15 = vmul.f32 %v3515_v28, %v3157_v31 }
 0x8d4   : > { %v3173_v57 = vadd.f32 %v3516_v32, %v3165_v15 }
 0x8d6   : > { %v3178_v41 = vpack.c.bf16 %v3173_v57, %v3172_v17 }
 0x8d8   : > { %3691 = vmatmul.mubr.msk.bf16.vlgmr.msra.gmra.mrb[24].mxu0 %vm476_vm0, %v3178_v41 }
 0x9ab   : > { %v3235_v50 = vpop.f32.mrb[24].mxu0 }
 0x9ac   : > { %v3236_v3 = vadd.f32 %v3517_v46, %v3235_v50  ;;  %v3692_v42 = vpop.f32.mrb[25].mxu0 }
 0x9ad   : > { %v3238_v51 = vpop.f32.mrb[26].mxu0 }
 0x9ae   : > { %v3242_v47 = vmul.f32 %v3236_v3, %v3236_v3  ;;  %v3239_v52 = vadd.f32 %v3517_v46, %v3238_v51  ;;  %v3693_v34 = vpop.f32.mrb[27].mxu0 }
 0x9b0   : > { %v3244_v45 = vmul.f32 %v3242_v47, %v3236_v3  ;;  %v3243_v35 = vmul.f32 %v3239_v52, %v3239_v52 }
 0x9b2   : > { %v3246_v36 = vmul.f32 0.044715, %v3244_v45  ;;  %v3245_v16 = vmul.f32 %v3243_v35, %v3239_v52 }
 0x9b4   : > { %v3248_v53 = vadd.f32 %v3246_v36, %v3236_v3  ;;  %v3247_v54 = vmul.f32 0.044715, %v3245_v16 }
 0x9b6   : > { %v3250_v38 = vmul.f32 0.7978846, %v3248_v53  ;;  %v3249_v55 = vadd.f32 %v3247_v54, %v3239_v52 }
 0x9b8   : > { %3835 = vtanh.f32 %v3250_v38  ;;  %v3251_v56 = vmul.f32 0.7978846, %v3249_v55 }
 0x9ba   : > { %3837 = vtanh.f32 %v3251_v56 }
 0x9c2   : > { %v3836_v58 = vpop.eup %3835 }
 0x9c3   : > { %v3254_v61 = vadd.f32 1.0, %v3836_v58 }
 0x9c4   : > { %v3838_v62 = vpop.eup %3837 }
 0x9c5   : > { %v3256_v63 = vmul.f32 0.5, %v3254_v61  ;;  %v3255_v9 = vadd.f32 1.0, %v3838_v62 }
 0x9c7   : > { %v3257_v8 = vmul.f32 0.5, %v3255_v9  ;;  %v3258_v12 = vmul.f32 %v3256_v63, %v3236_v3 }
 0x9c9   : > { %v3259_v6 = vmul.f32 %v3257_v8, %v3239_v52 }
 0x9cb   : > { %v3276_v24 = vpack.c.bf16 %v3259_v6, %v3258_v12 }
 0x9cd   : > { %3711 = vmatmul.mubr.bf16.vlgmr.msra.gmra.mrb[16].mxu1 %v3276_v24 }
 0xaa0   : > { %v3359_v7 = vpop.f32.mrb[16].mxu1 }
 0xaa1   : > { %v3366_v10 = vadd.f32 %v3359_v7, %v4451_v0  ;;  %v3712_v11 = vpop.f32.mrb[17].mxu1 }
 0xaa2   : > { %v3362_v4 = vpop.f32.mrb[18].mxu1 }
 0xaa3   : > { %v3375_v2 = vadd.f32 %v3529_v1, %v3366_v10  ;;  %v3367_v5 = vadd.f32 %v3362_v4, %v4454_v13  ;;  %v3713_v14 = vpop.f32.mrb[19].mxu1 }
 0xaa5   : > { %v3377_v18 = vpack.c.bf16 %v3375_v2, %v3375_v2  ;;  %v3376_v19 = vadd.f32 %v3529_v1, %v3367_v5 }
 0xaa7   : > { %3380 = vst.msk [vmem:[%s461_s21] sm:$0xf] %vm3379_vm5, %v3377_v18  ;;  %v3378_v0 = vpack.c.bf16 %v3376_v19, %v3376_v19 }
 0xaa9   : > { %3381 = vst.msk [vmem:[%s461_s21 + $0x4] sm:$0xf] %vm3379_vm5, %v3378_v0 }
 0xaaa   : > { %3852 = shalt.err (!%p3849_p3)
}
 0xaab   : > { %s3853_s0 = scalar_lea.hbm %s4522_s18, 128  ;;  %s3857_s27 = scalar_lea.hbm %s4583_s14, 256 }
 0xaac   : > { %p3854_p4 = scmp.ne.s32.totalorder %s4522_s18, %s3853_s0  ;;  %p3858_p9 = scmp.lt.u32.totalorder %s4522_s18, %s4583_s14 }
 0xaad   : > { %p3859_p10 = scmp.lt.u32.totalorder %s3857_s27, %s3853_s0  ;;  %p3861_p12 = scmp.lt.u32.totalorder %s3853_s0, %s4522_s18 }
 0xaae   : > { %p3855_p7 = pnand %p3854_p4, %p4030_p5 }
 0xaaf   : > { %p3860_p11 = por %p3859_p10, %p3858_p9 }
 0xab0   : > { %p3856_p8 = pneg %p3855_p7 }
 0xab1   : > { %p3862_p13 = por %p3861_p12, %p3860_p11 }
 0xab3   : > { %p3863_p0 = pnand %p3862_p13, %p3856_p8 }
 0xab5   : > { %3866 = shalt.err (!%p3863_p0)
}
 0xab6   : > { %s3916_s17 = smov 4   ;;  %s4593_s1 = smov 64  }
 0xab7   : > { %3714 = dma.vmem_to_hbm [thread:$0]  (%p4030_p5), %s4524_s26, 128, %s4522_s18, %s4526_s20, %s4593_s1, %s4593_s1, %s3916_s17  }
 0xab8 PF: > { %p3720_p1 = scmp.ge.s32.totalorder %s3901_s16, 2  ;;  %s3411_s25 = sand.u32 1, %s3889_s29  }
 0xab9   : > { %s3412_s0 = scalar_lea.sflag [#allocation3], %s3411_s25 }
 0xaba   : > { %p3717_p2 = pnand %p3720_p1, %p4034_p6 }
 0xabc   : > { %3884 = dma.done.wait (!%p3717_p2), %s3412_s0, 128  }
 0xabd   : > { %3886 = vsyncadd (!%p3717_p2), %s3412_s0, 4294967168  ;;  %p24_p3 = scmp.ge.s32.totalorder %s4017_s19, 4   ;;  %s4594_s29 = smov %s3893_s30 }
 0xabe   : > { %s4595_s30 = smov %s3897_s15  ;;  %s4596_s15 = smov %s4028_s22 }
 0xabf   : > { %s4597_s16 = smov %s4017_s19  ;;  %26 = sbr.rel (!%p24_p3) target bundleno = 7 (0x7), region = 111 }
 0xac6   :  { %3417 = vsyncpa [#allocation3], 1 }
 0xac7   :  { %3419 = vsyncpa [#allocation3 + $0x1], 1 }

</bundles_post_ra>
